<compile_context>
chip_gen: v7x
topology: tpu7x:2x2x1
jax: 0.10.0
libtpu: 0.0.40
codegen_flags: <defaults>
</compile_context>

<pallas_src>
import jax
import jax.numpy as jnp
from jax import lax
from jax.experimental import pallas as pl
from jax.experimental.pallas import tpu as pltpu


BATCH_TILE = 16        # images per grid step for K1/K2
N_CLASSES = 10


# ----------------------------- Pallas kernels -----------------------------

def _conv1_pool_abs_kernel(x_ref, w_ref, b_ref, o_ref):
    """x:(B,576,32) bf16   w:(32,128) bf16   b:(1,128) f32   o:(B,144,16) bf16.

    Rows of x are quadrant-major im2col patches: row q*144 + (ph*12+pw) holds
    the 25 (padded to 32) conv1 taps of conv position (2ph+dh, 2pw+dw) with
    q = dh*2 + dw.  Pool = elementwise max over the four quadrants.
    """
    bsz = x_ref.shape[0]
    x = x_ref[...]                                    # (B, 576, 32) bf16
    w = w_ref[...]                                    # (32, 128) bf16
    m = None
    for q in range(4):
        xs = x[:, q * 144:(q + 1) * 144, :].reshape(bsz * 144, 32)
        d = jnp.dot(xs, w, preferred_element_type=jnp.float32)   # (B*144, 128)
        m = d if m is None else jnp.maximum(m, d)
    y = jnp.abs(m + b_ref[...])                       # pool(conv1)+bias, |.|
    o_ref[...] = y[:, :16].astype(jnp.bfloat16).reshape(bsz, 144, 16)


def _conv2_pool_relu_bn_kernel(x_ref, w_ref, b_ref, sc_ref, sh_ref, o_ref):
    """x:(B,64,256) bf16  w:(256,32) bf16  b/sc/sh:(1,32) f32  o:(B,16,32) f32.

    Rows of x are quadrant-major conv2 im2col patches (K = 25 taps x 10 ch = 250
    real of 256): row q*16 + (PH*4+PW).  Pool = max over the four quadrants.
    """
    bsz = x_ref.shape[0]
    x = x_ref[...]                                    # (B, 64, 256) bf16
    w = w_ref[...]                                    # (256, 32) bf16
    m = None
    for q in range(4):
        xs = x[:, q * 16:(q + 1) * 16, :].reshape(bsz * 16, 256)
        d = jnp.dot(xs, w, preferred_element_type=jnp.float32)   # (B*16, 32)
        m = d if m is None else jnp.maximum(m, d)
    y = jnp.maximum(m + b_ref[...], 0.0)              # conv bias + relu (pool first)
    y = y * sc_ref[...] + sh_ref[...]                 # BatchNorm (eval, folded)
    o_ref[...] = y.reshape(bsz, 16, 32)


def _fc_softmax_kernel(x_ref, w1_ref, b1_ref, w2_ref, b2_ref, o_ref):
    """x:(tm,512) bf16  w1:(512,128) bf16  w2:(128,128) bf16  o:(tm,128) f32."""
    x = x_ref[...]
    h = jnp.dot(x, w1_ref[...], preferred_element_type=jnp.float32) + b1_ref[...]
    h = jnp.maximum(h, 0.0)                           # fc1 + relu (dropout = id)
    logits = jnp.dot(h.astype(jnp.bfloat16), w2_ref[...],
                     preferred_element_type=jnp.float32) + b2_ref[...]
    col = lax.broadcasted_iota(jnp.int32, logits.shape, 1)
    logits = jnp.where(col < N_CLASSES, logits, -1e30)   # mask padded class lanes
    mx = jnp.max(logits, axis=-1, keepdims=True)
    e = jnp.exp(logits - mx)
    s = jnp.sum(e, axis=-1, keepdims=True)
    o_ref[...] = e * pl.reciprocal(s, approx=False)   # softmax(dim=1)


# ------------------------------ wrappers ----------------------------------

def _conv1_pool_abs(xq, w1c, b1row, bsz):
    n = xq.shape[0]
    return pl.pallas_call(
        _conv1_pool_abs_kernel,
        out_shape=jax.ShapeDtypeStruct((n, 144, 16), jnp.bfloat16),
        grid=(n // bsz,),
        in_specs=[
            pl.BlockSpec((bsz, 576, 32), lambda i: (i, 0, 0)),
            pl.BlockSpec((32, 128), lambda i: (0, 0)),
            pl.BlockSpec((1, 128), lambda i: (0, 0)),
        ],
        out_specs=pl.BlockSpec((bsz, 144, 16), lambda i: (i, 0, 0)),
        compiler_params=pltpu.CompilerParams(dimension_semantics=("parallel",)),
    )(xq, w1c, b1row)


def _conv2_pool_relu_bn(xq2, w2c, b2row, scale_row, shift_row, bsz):
    n = xq2.shape[0]
    return pl.pallas_call(
        _conv2_pool_relu_bn_kernel,
        out_shape=jax.ShapeDtypeStruct((n, 16, 32), jnp.float32),
        grid=(n // bsz,),
        in_specs=[
            pl.BlockSpec((bsz, 64, 256), lambda i: (i, 0, 0)),
            pl.BlockSpec((256, 32), lambda i: (0, 0)),
            pl.BlockSpec((1, 32), lambda i: (0, 0)),
            pl.BlockSpec((1, 32), lambda i: (0, 0)),
            pl.BlockSpec((1, 32), lambda i: (0, 0)),
        ],
        out_specs=pl.BlockSpec((bsz, 16, 32), lambda i: (i, 0, 0)),
        compiler_params=pltpu.CompilerParams(dimension_semantics=("parallel",)),
    )(xq2, w2c, b2row, scale_row, shift_row)


def _fc_softmax(flat, wfc1p, bfc1row, wfc2p, bfc2row, tm):
    rows = flat.shape[0]
    return pl.pallas_call(
        _fc_softmax_kernel,
        out_shape=jax.ShapeDtypeStruct((rows, 128), jnp.float32),
        grid=(rows // tm,),
        in_specs=[
            pl.BlockSpec((tm, 512), lambda i: (i, 0)),
            pl.BlockSpec((512, 128), lambda i: (0, 0)),
            pl.BlockSpec((1, 128), lambda i: (0, 0)),
            pl.BlockSpec((128, 128), lambda i: (0, 0)),
            pl.BlockSpec((1, 128), lambda i: (0, 0)),
        ],
        out_specs=pl.BlockSpec((tm, 128), lambda i: (i, 0)),
        compiler_params=pltpu.CompilerParams(dimension_semantics=("parallel",)),
    )(flat, wfc1p, bfc1row, wfc2p, bfc2row)


# ------------------------- XLA glue (cheap im2col) -------------------------

def _im2col_conv1(x):
    """(n,1,28,28) f32 -> (n,576,32) bf16; row q*144 + ph*12+pw, lane kh*5+kw."""
    n = x.shape[0]
    img = x[:, 0]                                                 # (n,28,28)
    taps = [img[:, kh:kh + 24, kw:kw + 24]
            for kh in range(5) for kw in range(5)]                # 25 x (n,24,24)
    pat = jnp.stack(taps, axis=-1)                                # (n,24,24,25)
    quads = [pat[:, dh::2, dw::2, :] for dh in (0, 1) for dw in (0, 1)]
    xq = jnp.stack(quads, axis=1).reshape(n, 576, 25)             # q-major rows
    xq = jnp.pad(xq, ((0, 0), (0, 0), (0, 7)))                    # K 25 -> 32
    return xq.astype(jnp.bfloat16)


def _im2col_conv2(a1):
    """(n,144,16) bf16 -> (n,64,256) bf16; row q*16 + PH*4+PW, lane t*10+ci."""
    n = a1.shape[0]
    a1r = a1[:, :, :10].reshape(n, 12, 12, 10)
    taps = [a1r[:, kh:kh + 8, kw:kw + 8, :]
            for kh in range(5) for kw in range(5)]                # 25 x (n,8,8,10)
    col = jnp.concatenate(taps, axis=-1)                          # (n,8,8,250)
    col = jnp.pad(col, ((0, 0), (0, 0), (0, 0), (0, 6)))          # (n,8,8,256)
    quads = [col[:, dh::2, dw::2, :] for dh in (0, 1) for dw in (0, 1)]
    xq2 = jnp.stack(quads, axis=1).reshape(n, 64, 256)            # q-major rows
    return xq2.astype(jnp.bfloat16)


# --------------------------- params & packing -----------------------------

def init_params(key):
    def uni(k, shape, fan_in):
        bound = 1.0 / (fan_in ** 0.5)
        return jax.random.uniform(k, shape, jnp.float32, -bound, bound)

    keys = jax.random.split(key, 8)
    return {
        "w_conv1": uni(keys[0], (10, 1, 5, 5), 1 * 5 * 5),
        "b_conv1": uni(keys[1], (10,), 1 * 5 * 5),
        "w_conv2": uni(keys[2], (20, 10, 5, 5), 10 * 5 * 5),
        "b_conv2": uni(keys[3], (20,), 10 * 5 * 5),
        "w_fc1":   uni(keys[4], (50, 320), 320),
        "b_fc1":   uni(keys[5], (50,), 320),
        "w_fc2":   uni(keys[6], (10, 50), 50),
        "b_fc2":   uni(keys[7], (10,), 50),
        # BatchNorm2d(20) defaults (eval / running stats)
        "bn_gamma": jnp.ones((20,), jnp.float32),
        "bn_beta":  jnp.zeros((20,), jnp.float32),
        "bn_mean":  jnp.zeros((20,), jnp.float32),
        "bn_var":   jnp.ones((20,), jnp.float32),
    }


def pack_params(p):
    """One-time preprocessing: weight re-layout, padding, BN folding, bf16."""
    f32, bf16 = jnp.float32, jnp.bfloat16
    # conv1 (10,1,5,5) -> (32,128): row kh*5+kw, col = out channel.
    w1 = jnp.transpose(p["w_conv1"].astype(f32)[:, 0], (1, 2, 0)).reshape(25, 10)
    w1c = jnp.pad(w1, ((0, 7), (0, 118))).astype(bf16)
    b1row = jnp.pad(p["b_conv1"].astype(f32), (0, 118)).reshape(1, 128)
    # conv2 (20,10,5,5) -> (256,32): row (kh*5+kw)*10+ci, col = out channel.
    w2 = jnp.transpose(p["w_conv2"].astype(f32), (2, 3, 1, 0)).reshape(250, 20)
    w2c = jnp.pad(w2, ((0, 6), (0, 12))).astype(bf16)
    b2row = jnp.pad(p["b_conv2"].astype(f32), (0, 12)).reshape(1, 32)
    # BatchNorm (eval) folded to per-channel scale/shift.
    eps = 1e-5
    scale = p["bn_gamma"] / jnp.sqrt(p["bn_var"] + eps)
    shift = p["bn_beta"] - p["bn_mean"] * scale
    scale_row = jnp.concatenate([scale, jnp.ones((12,), f32)]).reshape(1, 32)
    shift_row = jnp.pad(shift, (0, 12)).reshape(1, 32)
    # fc1 (50,320): torch flat index j = c*16 + r; kernel flat index k = r*32 + c.
    wfc1 = jnp.transpose(p["w_fc1"].astype(f32).reshape(50, 20, 16), (2, 1, 0))
    wfc1p = jnp.pad(wfc1, ((0, 0), (0, 12), (0, 78))).reshape(512, 128).astype(bf16)
    bfc1row = jnp.pad(p["b_fc1"].astype(f32), (0, 78)).reshape(1, 128)
    # fc2 (10,50) -> (128,128)
    wfc2p = jnp.pad(p["w_fc2"].astype(f32).T, ((0, 78), (0, 118))).astype(bf16)
    bfc2row = jnp.pad(p["b_fc2"].astype(f32), (0, 118)).reshape(1, 128)
    return {
        "w1c": w1c, "b1row": b1row, "w2c": w2c, "b2row": b2row,
        "scale_row": scale_row, "shift_row": shift_row,
        "wfc1p": wfc1p, "bfc1row": bfc1row, "wfc2p": wfc2p, "bfc2row": bfc2row,
    }


# ------------------------------ the model ---------------------------------

def net1_forward(x, pp):
    n = x.shape[0]
    bsz = max(1, min(BATCH_TILE, n))
    n_pad = ((n + bsz - 1) // bsz) * bsz
    if n_pad != n:
        x = jnp.pad(x, ((0, n_pad - n), (0, 0), (0, 0), (0, 0)))

    xq = _im2col_conv1(x)                                         # (n,576,32) bf16
    a1 = _conv1_pool_abs(xq, pp["w1c"], pp["b1row"], bsz)         # (n,144,16) bf16
    xq2 = _im2col_conv2(a1)                                       # (n,64,256) bf16
    a2 = _conv2_pool_relu_bn(xq2, pp["w2c"], pp["b2row"],
                             pp["scale_row"], pp["shift_row"], bsz)  # (n,16,32) f32

    flat = a2.reshape(n_pad, 512).astype(jnp.bfloat16)            # compact FC input
    tm = min(256, ((n_pad + 7) // 8) * 8)
    rows = ((n_pad + tm - 1) // tm) * tm
    if rows != n_pad:
        flat = jnp.pad(flat, ((0, rows - n_pad), (0, 0)))
    probs = _fc_softmax(flat, pp["wfc1p"], pp["bfc1row"],
                        pp["wfc2p"], pp["bfc2row"], tm)           # (rows,128)
    return probs[:n, :N_CLASSES]


# pure-JAX reference (same eval semantics) for a correctness self-check.
def net1_reference(x, p):
    hp = lax.Precision.HIGHEST
    dn = ("NCHW", "OIHW", "NCHW")
    y = lax.conv_general_dilated(x, p["w_conv1"], (1, 1), "VALID",
                                 dimension_numbers=dn, precision=hp)
    y = y + p["b_conv1"].reshape(1, -1, 1, 1)
    y = lax.reduce_window(y, -jnp.inf, lax.max, (1, 1, 2, 2), (1, 1, 2, 2), "VALID")
    y = jnp.abs(y)
    y = lax.conv_general_dilated(y, p["w_conv2"], (1, 1), "VALID",
                                 dimension_numbers=dn, precision=hp)
    y = y + p["b_conv2"].reshape(1, -1, 1, 1)
    y = lax.reduce_window(y, -jnp.inf, lax.max, (1, 1, 2, 2), (1, 1, 2, 2), "VALID")
    y = jnp.maximum(y, 0.0)
    scale = p["bn_gamma"] / jnp.sqrt(p["bn_var"] + 1e-5)
    shift = p["bn_beta"] - p["bn_mean"] * scale
    y = y * scale.reshape(1, -1, 1, 1) + shift.reshape(1, -1, 1, 1)
    y = y.reshape(-1, 320)
    y = jnp.maximum(jnp.dot(y, p["w_fc1"].T, precision=hp) + p["b_fc1"], 0.0)
    y = jnp.dot(y, p["w_fc2"].T, precision=hp) + p["b_fc2"]
    return jax.nn.softmax(y, axis=1)


if __name__ == "__main__":
    key = jax.random.PRNGKey(0)
    kx, kp = jax.random.split(key)
    # 28x28 single-channel input is implied by fc1: 320 = 20 * 4 * 4.
    x = jax.random.normal(kx, (2, 1, 28, 28), jnp.float32)
    params = init_params(kp)
    packed = pack_params(params)          # one-time weight preprocessing

    out = jax.jit(net1_forward)(x, packed)
    out = jax.block_until_ready(out)

    assert out.shape == (2, 10), out.shape
    assert bool(jnp.all(jnp.isfinite(out)))
    assert bool(jnp.allclose(jnp.sum(out, axis=1), 1.0, atol=1e-5))

    ref = net1_reference(x, params)
    err = float(jnp.max(jnp.abs(out - ref)))
    # Matmul operands are bf16 (per perf review); tolerance vs the f32 reference
    # is set accordingly (observed error is bf16-rounding level, ~1e-3).
    assert err < 3e-2, f"mismatch vs reference: {err}"
    print("KERNEL_OK")
</pallas_src>

<mosaic_0001>
module attributes {stable_mosaic.version = 11 : i64} {
  func.func @_conv1_pool_abs_kernel(%arg0: i32, %arg1: memref<2x576x32xbf16, #tpu.memory_space<vmem>>, %arg2: memref<32x128xbf16, #tpu.memory_space<vmem>>, %arg3: memref<1x128xf32, #tpu.memory_space<vmem>>, %arg4: memref<2x144x16xbf16, #tpu.memory_space<vmem>>) attributes {dimension_semantics = [#tpu.dimension_semantics<parallel>], iteration_bounds = array<i64: 1>, scalar_prefetch = 0 : i64, scratch_operands = 0 : i64, tpu.core_type = #tpu.core_type<tc>, window_params = [{transform_indices = @transform_0, window_bounds = array<i64: 2, 576, 32>}, {pipeline_mode = #tpu.pipeline_mode<synchronous>, transform_indices = @transform_1, window_bounds = array<i64: 32, 128>}, {pipeline_mode = #tpu.pipeline_mode<synchronous>, transform_indices = @transform_2, window_bounds = array<i64: 1, 128>}, {transform_indices = @transform_3, window_bounds = array<i64: 2, 144, 16>}]} {
    %c0 = arith.constant 0 : index
    %c0_0 = arith.constant 0 : index
    %c0_1 = arith.constant 0 : index
    %0 = vector.load %arg1[%c0, %c0_0, %c0_1] : memref<2x576x32xbf16, #tpu.memory_space<vmem>>, vector<2x576x32xbf16>
    %c0_2 = arith.constant 0 : index
    %c0_3 = arith.constant 0 : index
    %1 = vector.load %arg2[%c0_2, %c0_3] : memref<32x128xbf16, #tpu.memory_space<vmem>>, vector<32x128xbf16>
    %2 = vector.extract_strided_slice %0 {offsets = [0, 0, 0], sizes = [2, 144, 32], strides = [1, 1, 1]} : vector<2x576x32xbf16> to vector<2x144x32xbf16>
    %3 = vector.shape_cast %2 : vector<2x144x32xbf16> to vector<288x32xbf16>
    %cst = arith.constant dense<0.000000e+00> : vector<288x128xf32>
    %4 = tpu.matmul %3, %1, %cst {dimension_numbers = #tpu.dot_dimension_numbers<[1], [0], [0], [1], [0, 0, 1, 1], [], []>} : vector<288x32xbf16>, vector<32x128xbf16>, vector<288x128xf32> -> vector<288x128xf32>
    %5 = vector.extract_strided_slice %0 {offsets = [0, 144, 0], sizes = [2, 144, 32], strides = [1, 1, 1]} : vector<2x576x32xbf16> to vector<2x144x32xbf16>
    %6 = vector.shape_cast %5 : vector<2x144x32xbf16> to vector<288x32xbf16>
    %cst_4 = arith.constant dense<0.000000e+00> : vector<288x128xf32>
    %7 = tpu.matmul %6, %1, %cst_4 {dimension_numbers = #tpu.dot_dimension_numbers<[1], [0], [0], [1], [0, 0, 1, 1], [], []>} : vector<288x32xbf16>, vector<32x128xbf16>, vector<288x128xf32> -> vector<288x128xf32>
    %8 = arith.maximumf %4, %7 : vector<288x128xf32>
    %9 = vector.extract_strided_slice %0 {offsets = [0, 288, 0], sizes = [2, 144, 32], strides = [1, 1, 1]} : vector<2x576x32xbf16> to vector<2x144x32xbf16>
    %10 = vector.shape_cast %9 : vector<2x144x32xbf16> to vector<288x32xbf16>
    %cst_5 = arith.constant dense<0.000000e+00> : vector<288x128xf32>
    %11 = tpu.matmul %10, %1, %cst_5 {dimension_numbers = #tpu.dot_dimension_numbers<[1], [0], [0], [1], [0, 0, 1, 1], [], []>} : vector<288x32xbf16>, vector<32x128xbf16>, vector<288x128xf32> -> vector<288x128xf32>
    %12 = arith.maximumf %8, %11 : vector<288x128xf32>
    %13 = vector.extract_strided_slice %0 {offsets = [0, 432, 0], sizes = [2, 144, 32], strides = [1, 1, 1]} : vector<2x576x32xbf16> to vector<2x144x32xbf16>
    %14 = vector.shape_cast %13 : vector<2x144x32xbf16> to vector<288x32xbf16>
    %cst_6 = arith.constant dense<0.000000e+00> : vector<288x128xf32>
    %15 = tpu.matmul %14, %1, %cst_6 {dimension_numbers = #tpu.dot_dimension_numbers<[1], [0], [0], [1], [0, 0, 1, 1], [], []>} : vector<288x32xbf16>, vector<32x128xbf16>, vector<288x128xf32> -> vector<288x128xf32>
    %16 = arith.maximumf %12, %15 : vector<288x128xf32>
    %c0_7 = arith.constant 0 : index
    %c0_8 = arith.constant 0 : index
    %17 = vector.load %arg3[%c0_7, %c0_8] : memref<1x128xf32, #tpu.memory_space<vmem>>, vector<1x128xf32>
    %18 = vector.broadcast %17 : vector<1x128xf32> to vector<288x128xf32>
    %19 = arith.addf %16, %18 : vector<288x128xf32>
    %20 = math.absf %19 : vector<288x128xf32>
    %21 = vector.extract_strided_slice %20 {offsets = [0, 0], sizes = [288, 16], strides = [1, 1]} : vector<288x128xf32> to vector<288x16xf32>
    %22 = arith.truncf %21 : vector<288x16xf32> to vector<288x16xbf16>
    %23 = vector.shape_cast %22 : vector<288x16xbf16> to vector<2x144x16xbf16>
    %c0_9 = arith.constant 0 : index
    %c0_10 = arith.constant 0 : index
    %c0_11 = arith.constant 0 : index
    %24 = vector.load %arg4[%c0_9, %c0_10, %c0_11] : memref<2x144x16xbf16, #tpu.memory_space<vmem>>, vector<2x144x16xbf16>
    tpu.vector_store %arg4[%c0_9, %c0_10, %c0_11], %23 {strides = array<i32>} : memref<2x144x16xbf16, #tpu.memory_space<vmem>>, vector<2x144x16xbf16>,
    return
  }
  func.func @transform_0(%arg0: i32) -> (i32, i32, i32) {
    %c0_i32 = arith.constant 0 : i32
    %c0_i32_0 = arith.constant 0 : i32
    %c0_i32_1 = arith.constant 0 : i32
    return %arg0, %c0_i32, %c0_i32_0 : i32, i32, i32
  }
  func.func @transform_1(%arg0: i32) -> (i32, i32) {
    %c0_i32 = arith.constant 0 : i32
    %c0_i32_0 = arith.constant 0 : i32
    %c0_i32_1 = arith.constant 0 : i32
    return %c0_i32, %c0_i32_0 : i32, i32
  }
  func.func @transform_2(%arg0: i32) -> (i32, i32) {
    %c0_i32 = arith.constant 0 : i32
    %c0_i32_0 = arith.constant 0 : i32
    %c0_i32_1 = arith.constant 0 : i32
    return %c0_i32, %c0_i32_0 : i32, i32
  }
  func.func @transform_3(%arg0: i32) -> (i32, i32, i32) {
    %c0_i32 = arith.constant 0 : i32
    %c0_i32_0 = arith.constant 0 : i32
    %c0_i32_1 = arith.constant 0 : i32
    return %arg0, %c0_i32, %c0_i32_0 : i32, i32, i32
  }
}

module attributes {stable_mosaic.version = 11 : i64} {
  func.func @_conv2_pool_relu_bn_kernel(%arg0: i32, %arg1: memref<2x64x256xbf16, #tpu.memory_space<vmem>>, %arg2: memref<256x32xbf16, #tpu.memory_space<vmem>>, %arg3: memref<1x32xf32, #tpu.memory_space<vmem>>, %arg4: memref<1x32xf32, #tpu.memory_space<vmem>>, %arg5: memref<1x32xf32, #tpu.memory_space<vmem>>, %arg6: memref<2x16x32xf32, #tpu.memory_space<vmem>>) attributes {dimension_semantics = [#tpu.dimension_semantics<parallel>], iteration_bounds = array<i64: 1>, scalar_prefetch = 0 : i64, scratch_operands = 0 : i64, tpu.core_type = #tpu.core_type<tc>, window_params = [{transform_indices = @transform_0, window_bounds = array<i64: 2, 64, 256>}, {pipeline_mode = #tpu.pipeline_mode<synchronous>, transform_indices = @transform_1, window_bounds = array<i64: 256, 32>}, {pipeline_mode = #tpu.pipeline_mode<synchronous>, transform_indices = @transform_2, window_bounds = array<i64: 1, 32>}, {pipeline_mode = #tpu.pipeline_mode<synchronous>, transform_indices = @transform_3, window_bounds = array<i64: 1, 32>}, {pipeline_mode = #tpu.pipeline_mode<synchronous>, transform_indices = @transform_4, window_bounds = array<i64: 1, 32>}, {transform_indices = @transform_5, window_bounds = array<i64: 2, 16, 32>}]} {
    %c0 = arith.constant 0 : index
    %c0_0 = arith.constant 0 : index
    %c0_1 = arith.constant 0 : index
    %0 = vector.load %arg1[%c0, %c0_0, %c0_1] : memref<2x64x256xbf16, #tpu.memory_space<vmem>>, vector<2x64x256xbf16>
    %c0_2 = arith.constant 0 : index
    %c0_3 = arith.constant 0 : index
    %1 = vector.load %arg2[%c0_2, %c0_3] : memref<256x32xbf16, #tpu.memory_space<vmem>>, vector<256x32xbf16>
    %2 = vector.extract_strided_slice %0 {offsets = [0, 0, 0], sizes = [2, 16, 256], strides = [1, 1, 1]} : vector<2x64x256xbf16> to vector<2x16x256xbf16>
    %3 = vector.shape_cast %2 : vector<2x16x256xbf16> to vector<32x256xbf16>
    %cst = arith.constant dense<0.000000e+00> : vector<32x32xf32>
    %4 = tpu.matmul %3, %1, %cst {dimension_numbers = #tpu.dot_dimension_numbers<[1], [0], [0], [1], [0, 0, 1, 1], [], []>} : vector<32x256xbf16>, vector<256x32xbf16>, vector<32x32xf32> -> vector<32x32xf32>
    %5 = vector.extract_strided_slice %0 {offsets = [0, 16, 0], sizes = [2, 16, 256], strides = [1, 1, 1]} : vector<2x64x256xbf16> to vector<2x16x256xbf16>
    %6 = vector.shape_cast %5 : vector<2x16x256xbf16> to vector<32x256xbf16>
    %cst_4 = arith.constant dense<0.000000e+00> : vector<32x32xf32>
    %7 = tpu.matmul %6, %1, %cst_4 {dimension_numbers = #tpu.dot_dimension_numbers<[1], [0], [0], [1], [0, 0, 1, 1], [], []>} : vector<32x256xbf16>, vector<256x32xbf16>, vector<32x32xf32> -> vector<32x32xf32>
    %8 = arith.maximumf %4, %7 : vector<32x32xf32>
    %9 = vector.extract_strided_slice %0 {offsets = [0, 32, 0], sizes = [2, 16, 256], strides = [1, 1, 1]} : vector<2x64x256xbf16> to vector<2x16x256xbf16>
    %10 = vector.shape_cast %9 : vector<2x16x256xbf16> to vector<32x256xbf16>
    %cst_5 = arith.constant dense<0.000000e+00> : vector<32x32xf32>
    %11 = tpu.matmul %10, %1, %cst_5 {dimension_numbers = #tpu.dot_dimension_numbers<[1], [0], [0], [1], [0, 0, 1, 1], [], []>} : vector<32x256xbf16>, vector<256x32xbf16>, vector<32x32xf32> -> vector<32x32xf32>
    %12 = arith.maximumf %8, %11 : vector<32x32xf32>
    %13 = vector.extract_strided_slice %0 {offsets = [0, 48, 0], sizes = [2, 16, 256], strides = [1, 1, 1]} : vector<2x64x256xbf16> to vector<2x16x256xbf16>
    %14 = vector.shape_cast %13 : vector<2x16x256xbf16> to vector<32x256xbf16>
    %cst_6 = arith.constant dense<0.000000e+00> : vector<32x32xf32>
    %15 = tpu.matmul %14, %1, %cst_6 {dimension_numbers = #tpu.dot_dimension_numbers<[1], [0], [0], [1], [0, 0, 1, 1], [], []>} : vector<32x256xbf16>, vector<256x32xbf16>, vector<32x32xf32> -> vector<32x32xf32>
    %16 = arith.maximumf %12, %15 : vector<32x32xf32>
    %c0_7 = arith.constant 0 : index
    %c0_8 = arith.constant 0 : index
    %17 = vector.load %arg3[%c0_7, %c0_8] : memref<1x32xf32, #tpu.memory_space<vmem>>, vector<1x32xf32>
    %18 = vector.broadcast %17 : vector<1x32xf32> to vector<32x32xf32>
    %19 = arith.addf %16, %18 : vector<32x32xf32>
    %cst_9 = arith.constant 0.000000e+00 : f32
    %20 = vector.broadcast %cst_9 : f32 to vector<32x32xf32>
    %21 = arith.maximumf %19, %20 : vector<32x32xf32>
    %c0_10 = arith.constant 0 : index
    %c0_11 = arith.constant 0 : index
    %22 = vector.load %arg4[%c0_10, %c0_11] : memref<1x32xf32, #tpu.memory_space<vmem>>, vector<1x32xf32>
    %23 = vector.broadcast %22 : vector<1x32xf32> to vector<32x32xf32>
    %24 = arith.mulf %21, %23 : vector<32x32xf32>
    %c0_12 = arith.constant 0 : index
    %c0_13 = arith.constant 0 : index
    %25 = vector.load %arg5[%c0_12, %c0_13] : memref<1x32xf32, #tpu.memory_space<vmem>>, vector<1x32xf32>
    %26 = vector.broadcast %25 : vector<1x32xf32> to vector<32x32xf32>
    %27 = arith.addf %24, %26 : vector<32x32xf32>
    %28 = vector.shape_cast %27 : vector<32x32xf32> to vector<2x16x32xf32>
    %c0_14 = arith.constant 0 : index
    %c0_15 = arith.constant 0 : index
    %c0_16 = arith.constant 0 : index
    %29 = vector.load %arg6[%c0_14, %c0_15, %c0_16] : memref<2x16x32xf32, #tpu.memory_space<vmem>>, vector<2x16x32xf32>
    tpu.vector_store %arg6[%c0_14, %c0_15, %c0_16], %28 {strides = array<i32>} : memref<2x16x32xf32, #tpu.memory_space<vmem>>, vector<2x16x32xf32>,
    return
  }
  func.func @transform_0(%arg0: i32) -> (i32, i32, i32) {
    %c0_i32 = arith.constant 0 : i32
    %c0_i32_0 = arith.constant 0 : i32
    %c0_i32_1 = arith.constant 0 : i32
    return %arg0, %c0_i32, %c0_i32_0 : i32, i32, i32
  }
  func.func @transform_1(%arg0: i32) -> (i32, i32) {
    %c0_i32 = arith.constant 0 : i32
    %c0_i32_0 = arith.constant 0 : i32
    %c0_i32_1 = arith.constant 0 : i32
    return %c0_i32, %c0_i32_0 : i32, i32
  }
  func.func @transform_2(%arg0: i32) -> (i32, i32) {
    %c0_i32 = arith.constant 0 : i32
    %c0_i32_0 = arith.constant 0 : i32
    %c0_i32_1 = arith.constant 0 : i32
    return %c0_i32, %c0_i32_0 : i32, i32
  }
  func.func @transform_3(%arg0: i32) -> (i32, i32) {
    %c0_i32 = arith.constant 0 : i32
    %c0_i32_0 = arith.constant 0 : i32
    %c0_i32_1 = arith.constant 0 : i32
    return %c0_i32, %c0_i32_0 : i32, i32
  }
  func.func @transform_4(%arg0: i32) -> (i32, i32) {
    %c0_i32 = arith.constant 0 : i32
    %c0_i32_0 = arith.constant 0 : i32
    %c0_i32_1 = arith.constant 0 : i32
    return %c0_i32, %c0_i32_0 : i32, i32
  }
  func.func @transform_5(%arg0: i32) -> (i32, i32, i32) {
    %c0_i32 = arith.constant 0 : i32
    %c0_i32_0 = arith.constant 0 : i32
    %c0_i32_1 = arith.constant 0 : i32
    return %arg0, %c0_i32, %c0_i32_0 : i32, i32, i32
  }
}

module attributes {stable_mosaic.version = 11 : i64} {
  func.func @_fc_softmax_kernel(%arg0: i32, %arg1: memref<8x512xbf16, #tpu.memory_space<vmem>>, %arg2: memref<512x128xbf16, #tpu.memory_space<vmem>>, %arg3: memref<1x128xf32, #tpu.memory_space<vmem>>, %arg4: memref<128x128xbf16, #tpu.memory_space<vmem>>, %arg5: memref<1x128xf32, #tpu.memory_space<vmem>>, %arg6: memref<8x128xf32, #tpu.memory_space<vmem>>) attributes {dimension_semantics = [#tpu.dimension_semantics<parallel>], iteration_bounds = array<i64: 1>, scalar_prefetch = 0 : i64, scratch_operands = 0 : i64, tpu.core_type = #tpu.core_type<tc>, window_params = [{transform_indices = @transform_0, window_bounds = array<i64: 8, 512>}, {pipeline_mode = #tpu.pipeline_mode<synchronous>, transform_indices = @transform_1, window_bounds = array<i64: 512, 128>}, {pipeline_mode = #tpu.pipeline_mode<synchronous>, transform_indices = @transform_2, window_bounds = array<i64: 1, 128>}, {pipeline_mode = #tpu.pipeline_mode<synchronous>, transform_indices = @transform_3, window_bounds = array<i64: 128, 128>}, {pipeline_mode = #tpu.pipeline_mode<synchronous>, transform_indices = @transform_4, window_bounds = array<i64: 1, 128>}, {transform_indices = @transform_5, window_bounds = array<i64: 8, 128>}]} {
    %c0 = arith.constant 0 : index
    %c0_0 = arith.constant 0 : index
    %0 = vector.load %arg1[%c0, %c0_0] : memref<8x512xbf16, #tpu.memory_space<vmem>>, vector<8x512xbf16>
    %c0_1 = arith.constant 0 : index
    %c0_2 = arith.constant 0 : index
    %1 = vector.load %arg2[%c0_1, %c0_2] : memref<512x128xbf16, #tpu.memory_space<vmem>>, vector<512x128xbf16>
    %cst = arith.constant dense<0.000000e+00> : vector<8x128xf32>
    %2 = tpu.matmul %0, %1, %cst {dimension_numbers = #tpu.dot_dimension_numbers<[1], [0], [0], [1], [0, 0, 1, 1], [], []>} : vector<8x512xbf16>, vector<512x128xbf16>, vector<8x128xf32> -> vector<8x128xf32>
    %c0_3 = arith.constant 0 : index
    %c0_4 = arith.constant 0 : index
    %3 = vector.load %arg3[%c0_3, %c0_4] : memref<1x128xf32, #tpu.memory_space<vmem>>, vector<1x128xf32>
    %4 = vector.broadcast %3 : vector<1x128xf32> to vector<8x128xf32>
    %5 = arith.addf %2, %4 : vector<8x128xf32>
    %cst_5 = arith.constant 0.000000e+00 : f32
    %6 = vector.broadcast %cst_5 : f32 to vector<8x128xf32>
    %7 = arith.maximumf %5, %6 : vector<8x128xf32>
    %8 = arith.truncf %7 : vector<8x128xf32> to vector<8x128xbf16>
    %c0_6 = arith.constant 0 : index
    %c0_7 = arith.constant 0 : index
    %9 = vector.load %arg4[%c0_6, %c0_7] : memref<128x128xbf16, #tpu.memory_space<vmem>>, vector<128x128xbf16>
    %cst_8 = arith.constant dense<0.000000e+00> : vector<8x128xf32>
    %10 = tpu.matmul %8, %9, %cst_8 {dimension_numbers = #tpu.dot_dimension_numbers<[1], [0], [0], [1], [0, 0, 1, 1], [], []>} : vector<8x128xbf16>, vector<128x128xbf16>, vector<8x128xf32> -> vector<8x128xf32>
    %c0_9 = arith.constant 0 : index
    %c0_10 = arith.constant 0 : index
    %11 = vector.load %arg5[%c0_9, %c0_10] : memref<1x128xf32, #tpu.memory_space<vmem>>, vector<1x128xf32>
    %12 = vector.broadcast %11 : vector<1x128xf32> to vector<8x128xf32>
    %13 = arith.addf %10, %12 : vector<8x128xf32>
    %14 = tpu.iota {dimensions = array<i32: 1>} : vector<8x128xi32>
    %c10_i32 = arith.constant 10 : i32
    %15 = vector.broadcast %c10_i32 : i32 to vector<8x128xi32>
    %16 = arith.cmpi slt, %14, %15 : vector<8x128xi32>
    %cst_11 = arith.constant -1.000000e+30 : f32
    %17 = vector.broadcast %cst_11 : f32 to vector<8x128xf32>
    %18 = arith.select %16, %13, %17 : vector<8x128xi1>, vector<8x128xf32>
    %cst_12 = arith.constant dense<0xFF800000> : vector<8xf32>
    %19 = vector.multi_reduction <maximumf>, %18, %cst_12 [1] : vector<8x128xf32> to vector<8xf32>
    %20 = vector.shape_cast %19 : vector<8xf32> to vector<8x1xf32>
    %21 = vector.broadcast %20 : vector<8x1xf32> to vector<8x128xf32>
    %22 = arith.subf %18, %21 : vector<8x128xf32>
    %23 = math.exp %22 : vector<8x128xf32>
    %cst_13 = arith.constant dense<0.000000e+00> : vector<8xf32>
    %24 = vector.multi_reduction <add>, %23, %cst_13 [1] : vector<8x128xf32> to vector<8xf32>
    %25 = vector.shape_cast %24 : vector<8xf32> to vector<8x1xf32>
    %26 = tpu.reciprocal %25 : vector<8x1xf32> -> vector<8x1xf32>
    %27 = vector.broadcast %26 : vector<8x1xf32> to vector<8x128xf32>
    %28 = arith.mulf %23, %27 : vector<8x128xf32>
    %c0_14 = arith.constant 0 : index
    %c0_15 = arith.constant 0 : index
    %29 = vector.load %arg6[%c0_14, %c0_15] : memref<8x128xf32, #tpu.memory_space<vmem>>, vector<8x128xf32>
    tpu.vector_store %arg6[%c0_14, %c0_15], %28 {strides = array<i32>} : memref<8x128xf32, #tpu.memory_space<vmem>>, vector<8x128xf32>,
    return
  }
  func.func @transform_0(%arg0: i32) -> (i32, i32) {
    %c0_i32 = arith.constant 0 : i32
    %c0_i32_0 = arith.constant 0 : i32
    return %arg0, %c0_i32 : i32, i32
  }
  func.func @transform_1(%arg0: i32) -> (i32, i32) {
    %c0_i32 = arith.constant 0 : i32
    %c0_i32_0 = arith.constant 0 : i32
    %c0_i32_1 = arith.constant 0 : i32
    return %c0_i32, %c0_i32_0 : i32, i32
  }
  func.func @transform_2(%arg0: i32) -> (i32, i32) {
    %c0_i32 = arith.constant 0 : i32
    %c0_i32_0 = arith.constant 0 : i32
    %c0_i32_1 = arith.constant 0 : i32
    return %c0_i32, %c0_i32_0 : i32, i32
  }
  func.func @transform_3(%arg0: i32) -> (i32, i32) {
    %c0_i32 = arith.constant 0 : i32
    %c0_i32_0 = arith.constant 0 : i32
    %c0_i32_1 = arith.constant 0 : i32
    return %c0_i32, %c0_i32_0 : i32, i32
  }
  func.func @transform_4(%arg0: i32) -> (i32, i32) {
    %c0_i32 = arith.constant 0 : i32
    %c0_i32_0 = arith.constant 0 : i32
    %c0_i32_1 = arith.constant 0 : i32
    return %c0_i32, %c0_i32_0 : i32, i32
  }
  func.func @transform_5(%arg0: i32) -> (i32, i32) {
    %c0_i32 = arith.constant 0 : i32
    %c0_i32_0 = arith.constant 0 : i32
    return %arg0, %c0_i32 : i32, i32
  }
}

</mosaic_0001>

<bundles_post_ra>
// kernel: net1_forward.3
= control target key start
LH: loop header
LB: loop body
LE: loop exit
PB: predicated region body
PF: predicated region fallthrough
CT: control target
= control target key end

     0   :  { %vm265_vm0 = vcmask 261120   ;;  %vm1791_vm1 = vcmask 125952   ;;  %s3188_s1 = inlined_call_operand.vmem [shape: bf16[32,128], index: 1, kind: input, shape index: {}]   ;;  %s3189_s0 = inlined_call_operand.vmem [shape: bf16[2,576,32], index: 0, kind: input, shape index: {}]   ;;  %s3190_s2 = inlined_call_operand.vmem [shape: f32[1,128], index: 2, kind: input, shape index: {}]   ;;  %s3191_s3 = inlined_call_operand.vmem [shape: bf16[2,144,16], index: 3, kind: output, shape index: {}]  }
   0x1   :  { %v2291_v0 = vld [vmem:[%s3188_s1] sm:$0xff]   ;;  %v2292_v1 = vld [vmem:[%s3188_s1 + $0x8] sm:$0xff]   ;;  %v2296_v5 = vld [vmem:[%s3189_s0 + $0x50] sm:$0xff]  }
   0x2   :  { %2131 = vmatprep.subr.bf16.mxu0 %v2291_v0  ;;  %2171 = vmatprep.subr.bf16.mxu1 %v2291_v0  ;;  %v2293_v2 = vld [vmem:[%s3189_s0] sm:$0xff]   ;;  %v2294_v3 = vld [vmem:[%s3189_s0 + $0x48] sm:$0xff]   ;;  %v2297_v6 = vld [vmem:[%s3189_s0 + $0x10] sm:$0xff]  }
   0x3   :  { %2132 = vmatpush3.bf16.msra.mxu0 %v2291_v0  ;;  %2172 = vmatpush3.bf16.msra.mxu1 %v2291_v0  ;;  %v2295_v4 = vld [vmem:[%s3189_s0 + $0x8] sm:$0xff]   ;;  %v2298_v7 = vld [vmem:[%s3189_s0 + $0x58] sm:$0xff]   ;;  %v2300_v9 = vld [vmem:[%s3189_s0 + $0x60] sm:$0xff]  }
   0x4   :  { %2133 = vmatprep.subr.bf16.mxu0 %v2292_v1  ;;  %2173 = vmatprep.subr.bf16.mxu1 %v2292_v1  ;;  %v2299_v8 = vld [vmem:[%s3189_s0 + $0x18] sm:$0xff]   ;;  %v2301_v10 = vld [vmem:[%s3189_s0 + $0x20] sm:$0xff]   ;;  %v2302_v11 = vld [vmem:[%s3189_s0 + $0x68] sm:$0xff]  }
   0x5   :  { %2135 = vmatprep.mubr.msk.bf16.mxu0 %vm265_vm0, %v2293_v2  ;;  %2175 = vmatprep.mubr.msk.bf16.mxu1 %vm265_vm0, %v2294_v3  ;;  %v2303_v12 = vld [vmem:[%s3189_s0 + $0x28] sm:$0xff]   ;;  %v2304_v13 = vld [vmem:[%s3189_s0 + $0x70] sm:$0xff]   ;;  %v2306_v15 = vld [vmem:[%s3189_s0 + $0x78] sm:$0xff]  }
   0x6   :  { %v2305_v14 = vld [vmem:[%s3189_s0 + $0x30] sm:$0xff]   ;;  %v2307_v16 = vld [vmem:[%s3189_s0 + $0x38] sm:$0xff]   ;;  %v2308_v17 = vld [vmem:[%s3189_s0 + $0x80] sm:$0xff]  }
   0x7   :  { %2134 = vmatpush3.bf16.msra.mxu0 %v2292_v1  ;;  %2174 = vmatpush3.bf16.msra.mxu1 %v2292_v1  ;;  %v2309_v18 = vld [vmem:[%s3189_s0 + $0x40] sm:$0xff]   ;;  %v2310_v19 = vld [vmem:[%s3189_s0 + $0x88] sm:$0xff]   ;;  %v2314_v23 = vld [vmem:[%s3189_s0 + $0x170] sm:$0xff]  }
   0x8   :  { %2211 = vmatprep.subr.bf16.mxu0 %v2291_v0  ;;  %2251 = vmatprep.subr.bf16.mxu1 %v2291_v0  ;;  %v2311_v20 = vld [vmem:[%s3189_s0 + $0x120] sm:$0xff]   ;;  %v2312_v21 = vld [vmem:[%s3189_s0 + $0x168] sm:$0xff]   ;;  %v2315_v24 = vld [vmem:[%s3189_s0 + $0x130] sm:$0xff]  }
   0x9   :  { %v2313_v22 = vld [vmem:[%s3189_s0 + $0x128] sm:$0xff]   ;;  %v2316_v25 = vld [vmem:[%s3189_s0 + $0x178] sm:$0xff]   ;;  %v2318_v27 = vld [vmem:[%s3189_s0 + $0x180] sm:$0xff]  }
   0xa   :  { %2136 = vmatmul.mubr.msk.bf16.vlgmr.msra.gmra.mrb[0].mxu0 %vm265_vm0, %v2295_v4  ;;  %2176 = vmatmul.mubr.msk.bf16.vlgmr.msra.gmra.mrb[0].mxu1 %vm265_vm0, %v2296_v5  ;;  %v2317_v26 = vld [vmem:[%s3189_s0 + $0x138] sm:$0xff]   ;;  %v2319_v28 = vld [vmem:[%s3189_s0 + $0x140] sm:$0xff]   ;;  %v2320_v29 = vld [vmem:[%s3189_s0 + $0x188] sm:$0xff]  }
   0xb   :  { %2212 = vmatpush3.bf16.msra.mxu0 %v2291_v0  ;;  %2252 = vmatpush3.bf16.msra.mxu1 %v2291_v0  ;;  %v2321_v30 = vld [vmem:[%s3189_s0 + $0x148] sm:$0xff]   ;;  %v2322_v31 = vld [vmem:[%s3189_s0 + $0x190] sm:$0xff]   ;;  %v2324_v33 = vld [vmem:[%s3189_s0 + $0x198] sm:$0xff]  }
   0xc   :  { %2139 = vmatprep.mubr.msk.bf16.mxu0 %vm265_vm0, %v2297_v6  ;;  %2179 = vmatprep.mubr.msk.bf16.mxu1 %vm265_vm0, %v2298_v7  ;;  %v2323_v32 = vld [vmem:[%s3189_s0 + $0x150] sm:$0xff]   ;;  %v2325_v34 = vld [vmem:[%s3189_s0 + $0x158] sm:$0xff]   ;;  %v2326_v35 = vld [vmem:[%s3189_s0 + $0x1a0] sm:$0xff]  }
   0xd   :  { %2213 = vmatprep.subr.bf16.mxu0 %v2292_v1  ;;  %2253 = vmatprep.subr.bf16.mxu1 %v2292_v1  ;;  %v2327_v36 = vld [vmem:[%s3189_s0 + $0x160] sm:$0xff]   ;;  %v2328_v37 = vld [vmem:[%s3189_s0 + $0x1a8] sm:$0xff]   ;;  %v2329_v38 = vld [vmem:[%s3189_s0 + $0x90] sm:$0xff]  }
   0xe   :  { %v2330_v39 = vld [vmem:[%s3189_s0 + $0xd8] sm:$0xff]   ;;  %v2332_v41 = vld [vmem:[%s3189_s0 + $0xe0] sm:$0xff]   ;;  %v2334_v43 = vld [vmem:[%s3189_s0 + $0xe8] sm:$0xff]  }
   0xf   :  { %2214 = vmatpush3.bf16.msra.mxu0 %v2292_v1  ;;  %2254 = vmatpush3.bf16.msra.mxu1 %v2292_v1  ;;  %v2331_v40 = vld [vmem:[%s3189_s0 + $0x98] sm:$0xff]   ;;  %v2333_v42 = vld [vmem:[%s3189_s0 + $0xa0] sm:$0xff]   ;;  %v2335_v44 = vld [vmem:[%s3189_s0 + $0xa8] sm:$0xff]  }
  0x10   :  { %v2336_v45 = vld [vmem:[%s3189_s0 + $0xf0] sm:$0xff]   ;;  %v2338_v47 = vld [vmem:[%s3189_s0 + $0xf8] sm:$0xff]   ;;  %v2340_v49 = vld [vmem:[%s3189_s0 + $0x100] sm:$0xff]  }
  0x11   :  { %v2337_v46 = vld [vmem:[%s3189_s0 + $0xb0] sm:$0xff]   ;;  %v2339_v48 = vld [vmem:[%s3189_s0 + $0xb8] sm:$0xff]   ;;  %v2341_v50 = vld [vmem:[%s3189_s0 + $0xc0] sm:$0xff]  }
  0x12   :  { %2140 = vmatmul.mubr.msk.bf16.gmra.mrb[4].mxu0 %vm265_vm0, %v2299_v8  ;;  %2180 = vmatmul.mubr.msk.bf16.gmra.mrb[4].mxu1 %vm265_vm0, %v2300_v9  ;;  %v2342_v51 = vld [vmem:[%s3189_s0 + $0x108] sm:$0xff]   ;;  %v2344_v53 = vld [vmem:[%s3189_s0 + $0x110] sm:$0xff]   ;;  %v2346_v55 = vld [vmem:[%s3189_s0 + $0x118] sm:$0xff]  }
  0x13   :  { %2143 = vmatprep.mubr.msk.bf16.mxu0 %vm265_vm0, %v2301_v10  ;;  %2183 = vmatprep.mubr.msk.bf16.mxu1 %vm265_vm0, %v2302_v11  ;;  %v2343_v52 = vld [vmem:[%s3189_s0 + $0xc8] sm:$0xff]   ;;  %v2345_v54 = vld [vmem:[%s3189_s0 + $0xd0] sm:$0xff]   ;;  %v2348_v57 = vld [vmem:[%s3189_s0 + $0x1f8] sm:$0xff]  }
  0x14   :  { %v2347_v56 = vld [vmem:[%s3189_s0 + $0x1b0] sm:$0xff]   ;;  %v2349_v58 = vld [vmem:[%s3189_s0 + $0x1b8] sm:$0xff]   ;;  %v2350_v59 = vld [vmem:[%s3189_s0 + $0x200] sm:$0xff]  }
  0x15   :  { %v2351_v60 = vld [vmem:[%s3189_s0 + $0x1c0] sm:$0xff]   ;;  %v2352_v61 = vld [vmem:[%s3189_s0 + $0x208] sm:$0xff]   ;;  %v2354_v63 = vld [vmem:[%s3189_s0 + $0x210] sm:$0xff]  }
  0x16   :  { %v2353_v62 = vld [vmem:[%s3189_s0 + $0x1c8] sm:$0xff]   ;;  %v2355_v0 = vld [vmem:[%s3189_s0 + $0x1d0] sm:$0xff]   ;;  %v2356_v1 = vld [vmem:[%s3189_s0 + $0x218] sm:$0xff]  }
  0x17   :  { %v2357_v2 = vld [vmem:[%s3189_s0 + $0x1d8] sm:$0xff]   ;;  %v2358_v3 = vld [vmem:[%s3189_s0 + $0x220] sm:$0xff]   ;;  %v2360_v5 = vld [vmem:[%s3189_s0 + $0x228] sm:$0xff]  }
  0x18   :  { %v2359_v4 = vld [vmem:[%s3189_s0 + $0x1e0] sm:$0xff]   ;;  %v2361_v6 = vld [vmem:[%s3189_s0 + $0x1e8] sm:$0xff]   ;;  %v2362_v7 = vld [vmem:[%s3189_s0 + $0x230] sm:$0xff]  }
  0x19   :  { %v2363_v8 = vld [vmem:[%s3189_s0 + $0x1f0] sm:$0xff]   ;;  %v2364_v9 = vld [vmem:[%s3189_s0 + $0x238] sm:$0xff]  }
  0x1a   :  { %2144 = vmatmul.mubr.msk.bf16.gmra.mrb[8].mxu0 %vm265_vm0, %v2303_v12  ;;  %2184 = vmatmul.mubr.msk.bf16.gmra.mrb[8].mxu1 %vm265_vm0, %v2304_v13 }
  0x1b   :  { %2147 = vmatprep.mubr.msk.bf16.mxu0 %vm265_vm0, %v2305_v14  ;;  %2187 = vmatprep.mubr.msk.bf16.mxu1 %vm265_vm0, %v2306_v15 }
  0x22   :  { %2148 = vmatmul.mubr.msk.bf16.gmra.mrb[12].mxu0 %vm265_vm0, %v2307_v16  ;;  %2188 = vmatmul.mubr.msk.bf16.gmra.mrb[12].mxu1 %vm265_vm0, %v2308_v17 }
  0x23   :  { %2151 = vmatprep.mubr.msk.bf16.mxu0 %vm265_vm0, %v2309_v18  ;;  %2191 = vmatprep.mubr.msk.bf16.mxu1 %vm265_vm0, %v2310_v19 }
  0x2a   :  { %2152 = vmatmul.mubr.msk.bf16.gmra.mrb[16].mxu0 %vm265_vm0, %v2311_v20  ;;  %2192 = vmatmul.mubr.msk.bf16.gmra.mrb[16].mxu1 %vm265_vm0, %v2312_v21 }
  0x2b   :  { %2155 = vmatprep.mubr.msk.bf16.mxu0 %vm265_vm0, %v2313_v22  ;;  %2195 = vmatprep.mubr.msk.bf16.mxu1 %vm265_vm0, %v2314_v23 }
  0x32   :  { %2156 = vmatmul.mubr.msk.bf16.gmra.mrb[20].mxu0 %vm265_vm0, %v2315_v24  ;;  %2196 = vmatmul.mubr.msk.bf16.gmra.mrb[20].mxu1 %vm265_vm0, %v2316_v25 }
  0x33   :  { %2159 = vmatprep.mubr.msk.bf16.mxu0 %vm265_vm0, %v2317_v26  ;;  %2199 = vmatprep.mubr.msk.bf16.mxu1 %vm265_vm0, %v2318_v27 }
  0x3a   :  { %2160 = vmatmul.mubr.msk.bf16.gmra.mrb[24].mxu0 %vm265_vm0, %v2319_v28  ;;  %2200 = vmatmul.mubr.msk.bf16.gmra.mrb[24].mxu1 %vm265_vm0, %v2320_v29 }
  0x3b   :  { %2163 = vmatprep.mubr.msk.bf16.mxu0 %vm265_vm0, %v2321_v30  ;;  %2203 = vmatprep.mubr.msk.bf16.mxu1 %vm265_vm0, %v2322_v31 }
  0x42   :  { %2164 = vmatmul.mubr.msk.bf16.gmra.mrb[28].mxu0 %vm265_vm0, %v2323_v32  ;;  %2204 = vmatmul.mubr.msk.bf16.gmra.mrb[28].mxu1 %vm265_vm0, %v2324_v33 }
  0x43   :  { %2167 = vmatprep.mubr.msk.bf16.mxu0 %vm265_vm0, %v2325_v34  ;;  %2207 = vmatprep.mubr.msk.bf16.mxu1 %vm265_vm0, %v2326_v35 }
  0x4a   :  { %2168 = vmatmul.mubr.msk.bf16.gmra.mrb[32].mxu0 %vm265_vm0, %v2327_v36  ;;  %2208 = vmatmul.mubr.msk.bf16.gmra.mrb[32].mxu1 %vm265_vm0, %v2328_v37 }
  0x4b   :  { %2215 = vmatprep.mubr.msk.bf16.mxu0 %vm265_vm0, %v2329_v38  ;;  %2255 = vmatprep.mubr.msk.bf16.mxu1 %vm265_vm0, %v2330_v39 }
  0x52   :  { %2216 = vmatmul.mubr.msk.bf16.vlgmr.msra.gmra.mrb[36].mxu0 %vm265_vm0, %v2331_v40  ;;  %2256 = vmatmul.mubr.msk.bf16.vlgmr.msra.gmra.mrb[36].mxu1 %vm265_vm0, %v2332_v41 }
  0x53   :  { %2219 = vmatprep.mubr.msk.bf16.mxu0 %vm265_vm0, %v2333_v42  ;;  %2259 = vmatprep.mubr.msk.bf16.mxu1 %vm265_vm0, %v2334_v43 }
  0x5a   :  { %2220 = vmatmul.mubr.msk.bf16.gmra.mrb[40].mxu0 %vm265_vm0, %v2335_v44  ;;  %2260 = vmatmul.mubr.msk.bf16.gmra.mrb[40].mxu1 %vm265_vm0, %v2336_v45 }
  0x5b   :  { %2223 = vmatprep.mubr.msk.bf16.mxu0 %vm265_vm0, %v2337_v46  ;;  %2263 = vmatprep.mubr.msk.bf16.mxu1 %vm265_vm0, %v2338_v47 }
  0x62   :  { %2224 = vmatmul.mubr.msk.bf16.gmra.mrb[44].mxu0 %vm265_vm0, %v2339_v48  ;;  %2264 = vmatmul.mubr.msk.bf16.gmra.mrb[44].mxu1 %vm265_vm0, %v2340_v49 }
  0x63   :  { %2227 = vmatprep.mubr.msk.bf16.mxu0 %vm265_vm0, %v2341_v50  ;;  %2267 = vmatprep.mubr.msk.bf16.mxu1 %vm265_vm0, %v2342_v51 }
  0x6a   :  { %2228 = vmatmul.mubr.msk.bf16.gmra.mrb[48].mxu0 %vm265_vm0, %v2343_v52  ;;  %2268 = vmatmul.mubr.msk.bf16.gmra.mrb[48].mxu1 %vm265_vm0, %v2344_v53 }
  0x6b   :  { %2231 = vmatprep.mubr.msk.bf16.mxu0 %vm265_vm0, %v2345_v54  ;;  %2271 = vmatprep.mubr.msk.bf16.mxu1 %vm265_vm0, %v2346_v55 }
  0x72   :  { %2232 = vmatmul.mubr.msk.bf16.gmra.mrb[52].mxu0 %vm265_vm0, %v2347_v56  ;;  %2272 = vmatmul.mubr.msk.bf16.gmra.mrb[52].mxu1 %vm265_vm0, %v2348_v57 }
  0x73   :  { %2235 = vmatprep.mubr.msk.bf16.mxu0 %vm265_vm0, %v2349_v58  ;;  %2275 = vmatprep.mubr.msk.bf16.mxu1 %vm265_vm0, %v2350_v59 }
  0x7a   :  { %2236 = vmatmul.mubr.msk.bf16.gmra.mrb[56].mxu0 %vm265_vm0, %v2351_v60  ;;  %2276 = vmatmul.mubr.msk.bf16.gmra.mrb[56].mxu1 %vm265_vm0, %v2352_v61 }
  0x7b   :  { %2239 = vmatprep.mubr.msk.bf16.mxu0 %vm265_vm0, %v2353_v62  ;;  %2279 = vmatprep.mubr.msk.bf16.mxu1 %vm265_vm0, %v2354_v63 }
  0x82   :  { %2240 = vmatmul.mubr.msk.bf16.gmra.mrb[60].mxu0 %vm265_vm0, %v2355_v0  ;;  %2280 = vmatmul.mubr.msk.bf16.gmra.mrb[60].mxu1 %vm265_vm0, %v2356_v1 }
  0x83   :  { %2243 = vmatprep.mubr.msk.bf16.mxu0 %vm265_vm0, %v2357_v2  ;;  %2283 = vmatprep.mubr.msk.bf16.mxu1 %vm265_vm0, %v2358_v3 }
  0x8a   :  { %2244 = vmatmul.mubr.msk.bf16.gmra.mrb[64].mxu0 %vm265_vm0, %v2359_v4  ;;  %2284 = vmatmul.mubr.msk.bf16.gmra.mrb[64].mxu1 %vm265_vm0, %v2360_v5 }
  0x8b   :  { %2247 = vmatprep.mubr.msk.bf16.mxu0 %vm265_vm0, %v2361_v6  ;;  %2287 = vmatprep.mubr.msk.bf16.mxu1 %vm265_vm0, %v2362_v7 }
  0x92   :  { %2248 = vmatmul.mubr.msk.bf16.gmra.mrb[68].mxu0 %vm265_vm0, %v2363_v8  ;;  %2288 = vmatmul.mubr.msk.bf16.gmra.mrb[68].mxu1 %vm265_vm0, %v2364_v9 }
  0xdd   :  { %v2679_v10 = vpop.f32.mrb[0].mxu0  ;;  %v2681_v11 = vpop.f32.mrb[0].mxu1 }
  0xde   :  { %v2685_v13 = vpop.f32.mrb[1].mxu0  ;;  %v2687_v14 = vpop.f32.mrb[1].mxu1 }
  0xdf   :  { %v2691_v16 = vpop.f32.mrb[2].mxu0  ;;  %v2693_v17 = vpop.f32.mrb[2].mxu1  ;;  %v3243_v5 = vmax.f32 %v2685_v13, %v2687_v14 }
  0xe0   :  { %v2697_v19 = vpop.f32.mrb[3].mxu0  ;;  %v2699_v20 = vpop.f32.mrb[3].mxu1 }
  0xe5   :  { %v2703_v22 = vpop.f32.mrb[4].mxu0  ;;  %v2705_v23 = vpop.f32.mrb[4].mxu1 }
  0xe6   :  { %v2709_v25 = vpop.f32.mrb[5].mxu0  ;;  %v2711_v26 = vpop.f32.mrb[5].mxu1 }
  0xe7   :  { %v2715_v28 = vpop.f32.mrb[6].mxu0  ;;  %v2717_v29 = vpop.f32.mrb[6].mxu1 }
  0xe8   :  { %v2721_v31 = vpop.f32.mrb[7].mxu0  ;;  %v2723_v32 = vpop.f32.mrb[7].mxu1 }
  0xed   :  { %v2727_v34 = vpop.f32.mrb[8].mxu0  ;;  %v2729_v35 = vpop.f32.mrb[8].mxu1 }
  0xee   :  { %v2733_v37 = vpop.f32.mrb[9].mxu0  ;;  %v2735_v38 = vpop.f32.mrb[9].mxu1 }
  0xef   :  { %v2739_v40 = vpop.f32.mrb[10].mxu0  ;;  %v2741_v41 = vpop.f32.mrb[10].mxu1 }
  0xf0   :  { %v2745_v43 = vpop.f32.mrb[11].mxu0  ;;  %v2747_v44 = vpop.f32.mrb[11].mxu1 }
  0xf5   :  { %v2751_v46 = vpop.f32.mrb[12].mxu0  ;;  %v2753_v47 = vpop.f32.mrb[12].mxu1 }
  0xf6   :  { %v2757_v49 = vpop.f32.mrb[13].mxu0  ;;  %v2759_v50 = vpop.f32.mrb[13].mxu1 }
  0xf7   :  { %v2763_v52 = vpop.f32.mrb[14].mxu0  ;;  %v2765_v53 = vpop.f32.mrb[14].mxu1 }
  0xf8   :  { %v2769_v55 = vpop.f32.mrb[15].mxu0  ;;  %v2771_v56 = vpop.f32.mrb[15].mxu1 }
  0xfd   :  { %v2775_v58 = vpop.f32.mrb[16].mxu0  ;;  %v2777_v59 = vpop.f32.mrb[16].mxu1 }
  0xfe   :  { %v2781_v61 = vpop.f32.mrb[17].mxu0  ;;  %v2783_v62 = vpop.f32.mrb[17].mxu1 }
  0xff   :  { %v2787_v0 = vpop.f32.mrb[18].mxu0  ;;  %v2789_v1 = vpop.f32.mrb[18].mxu1 }
 0x100   :  { %v2793_v3 = vpop.f32.mrb[19].mxu0  ;;  %v2795_v4 = vpop.f32.mrb[19].mxu1 }
 0x105   :  { %v2799_v6 = vpop.f32.mrb[20].mxu0  ;;  %v2801_v7 = vpop.f32.mrb[20].mxu1 }
 0x106   :  { %v2805_v9 = vpop.f32.mrb[21].mxu0  ;;  %v2807_v63 = vpop.f32.mrb[21].mxu1 }
 0x107   :  { %v2811_v60 = vpop.f32.mrb[22].mxu0  ;;  %v2813_v57 = vpop.f32.mrb[22].mxu1 }
 0x108   :  { %v2817_v54 = vpop.f32.mrb[23].mxu0  ;;  %v2819_v51 = vpop.f32.mrb[23].mxu1 }
 0x109   :  { %3217 = vst [vmem:[#allocation2_spill] sm:$0xff] %v2819_v51 }
 0x10d   :  { %v2823_v48 = vpop.f32.mrb[24].mxu0  ;;  %v2825_v45 = vpop.f32.mrb[24].mxu1 }
 0x10e   :  { %3218 = vst [vmem:[#allocation3_spill] sm:$0xff] %v2823_v48  ;;  %3219 = vst [vmem:[#allocation4_spill] sm:$0xff] %v2825_v45  ;;  %v2829_v42 = vpop.f32.mrb[25].mxu0  ;;  %v2831_v39 = vpop.f32.mrb[25].mxu1 }
 0x10f   :  { %3220 = vst [vmem:[#allocation5_spill] sm:$0xff] %v2829_v42  ;;  %3221 = vst [vmem:[#allocation6_spill] sm:$0xff] %v2831_v39  ;;  %v2835_v36 = vpop.f32.mrb[26].mxu0  ;;  %v2837_v33 = vpop.f32.mrb[26].mxu1  ;;  %v2901_v39 = vld [vmem:[%s3190_s2] ss:$0 sm:$0xff] }
 0x110   :  { %3222 = vst [vmem:[#allocation7_spill] sm:$0xff] %v2835_v36  ;;  %3223 = vst [vmem:[#allocation8_spill] sm:$0xff] %v2837_v33  ;;  %v2841_v30 = vpop.f32.mrb[27].mxu0  ;;  %v2843_v27 = vpop.f32.mrb[27].mxu1  ;;  %v3242_v36 = vmax.f32 %v2679_v10, %v2681_v11 }
 0x111   :  { %3224 = vst [vmem:[#allocation9_spill] sm:$0xff] %v2841_v30  ;;  %3225 = vst [vmem:[#allocation10_spill] sm:$0xff] %v2843_v27 }
 0x115   :  { %v2847_v24 = vpop.f32.mrb[28].mxu0  ;;  %v2849_v21 = vpop.f32.mrb[28].mxu1 }
 0x116   :  { %3226 = vst [vmem:[#allocation11_spill] sm:$0xff] %v2847_v24  ;;  %3227 = vst [vmem:[#allocation12_spill] sm:$0xff] %v2849_v21  ;;  %v2853_v18 = vpop.f32.mrb[29].mxu0  ;;  %v2855_v15 = vpop.f32.mrb[29].mxu1 }
 0x117   :  { %3228 = vst [vmem:[#allocation13_spill] sm:$0xff] %v2853_v18  ;;  %3229 = vst [vmem:[#allocation14_spill] sm:$0xff] %v2855_v15  ;;  %v2859_v12 = vpop.f32.mrb[30].mxu0  ;;  %v2861_v33 = vpop.f32.mrb[30].mxu1 }
 0x118   :  { %3230 = vst [vmem:[#allocation15_spill] sm:$0xff] %v2859_v12  ;;  %3231 = vst [vmem:[#allocation16_spill] sm:$0xff] %v2861_v33  ;;  %v2865_v27 = vpop.f32.mrb[31].mxu0  ;;  %v2867_v30 = vpop.f32.mrb[31].mxu1 }
 0x119   :  { %3232 = vst [vmem:[#allocation17_spill] sm:$0xff] %v2865_v27  ;;  %3233 = vst [vmem:[#allocation18_spill] sm:$0xff] %v2867_v30 }
 0x11d   :  { %v2871_v21 = vpop.f32.mrb[32].mxu0  ;;  %v2873_v24 = vpop.f32.mrb[32].mxu1 }
 0x11e   :  { %3234 = vst [vmem:[#allocation19_spill] sm:$0xff] %v2871_v21  ;;  %3235 = vst [vmem:[#allocation20_spill] sm:$0xff] %v2873_v24  ;;  %v2877_v15 = vpop.f32.mrb[33].mxu0  ;;  %v2879_v18 = vpop.f32.mrb[33].mxu1 }
 0x11f   :  { %3236 = vst [vmem:[#allocation21_spill] sm:$0xff] %v2877_v15  ;;  %3237 = vst [vmem:[#allocation22_spill] sm:$0xff] %v2879_v18  ;;  %v2883_v33 = vpop.f32.mrb[34].mxu0  ;;  %v2885_v12 = vpop.f32.mrb[34].mxu1 }
 0x120   :  { %3238 = vst [vmem:[#allocation23_spill] sm:$0xff] %v2883_v33  ;;  %3239 = vst [vmem:[#allocation24_spill] sm:$0xff] %v2885_v12  ;;  %v2889_v30 = vpop.f32.mrb[35].mxu0  ;;  %v2891_v27 = vpop.f32.mrb[35].mxu1 }
 0x121   :  { %3240 = vst [vmem:[#allocation25_spill] sm:$0xff] %v2889_v30  ;;  %3241 = vst [vmem:[#allocation26_spill] sm:$0xff] %v2891_v27  ;;  %v3244_v27 = vmax.f32 %v2691_v16, %v2693_v17 }
 0x125   :  { %v2217_v24 = vpop.f32.mrb[36].mxu0  ;;  %v2257_v21 = vpop.f32.mrb[36].mxu1 }
 0x126   :  { %v1177_v2 = vmax.f32 %v3242_v36, %v2217_v24  ;;  %v1032_v18 = vpop.f32.mrb[37].mxu0  ;;  %v1389_v15 = vpop.f32.mrb[37].mxu1  ;;  %v3245_v36 = vmax.f32 %v2697_v19, %v2699_v20  ;;  %v3246_v19 = vmax.f32 %v2703_v22, %v2705_v23  ;;  %v3248_v22 = vmax.f32 %v2715_v28, %v2717_v29 }
 0x127   :  { %v1175_v12 = vmax.f32 %v3243_v5, %v1032_v18  ;;  %v2218_v33 = vpop.f32.mrb[38].mxu0  ;;  %v2258_v42 = vpop.f32.mrb[38].mxu1 }
 0x128   :  { %v1534_v8 = vmax.f32 %v1177_v2, %v2257_v21  ;;  %v1178_v30 = vmax.f32 %v3244_v27, %v2218_v33  ;;  %v1035_v10 = vpop.f32.mrb[39].mxu0  ;;  %v1392_v11 = vpop.f32.mrb[39].mxu1 }
 0x129   :  { %v1532_v24 = vmax.f32 %v1175_v12, %v1389_v15  ;;  %v1176_v45 = vmax.f32 %v3245_v36, %v1035_v10 }
 0x12a   :  { %v1577_v48 = vadd.f32 %v2901_v39, %v1534_v8  ;;  %v1535_v51 = vmax.f32 %v1178_v30, %v2258_v42 }
 0x12b   :  { %v1575_v13 = vadd.f32 %v2901_v39, %v1532_v24  ;;  %v1533_v14 = vmax.f32 %v1176_v45, %v1392_v11  ;;  %v3247_v45 = vmax.f32 %v2709_v25, %v2711_v26 }
 0x12c   :  { %v1613_v18 = vand.u32 2147483647, %v1577_v48  ;;  %v1578_v21 = vadd.f32 %v2901_v39, %v1535_v51 }
 0x12d   :  { %v1611_v2 = vand.u32 2147483647, %v1575_v13  ;;  %v1576_v16 = vadd.f32 %v2901_v39, %v1533_v14  ;;  %v2221_v17 = vpop.f32.mrb[40].mxu0  ;;  %v2261_v27 = vpop.f32.mrb[40].mxu1  ;;  %v3249_v13 = vmax.f32 %v2721_v31, %v2723_v32 }
 0x12e   :  { %v2017_v12 = vpack.c.bf16 %v1613_v18, %v1613_v18  ;;  %v1614_v15 = vand.u32 2147483647, %v1578_v21  ;;  %v1181_v20 = vmax.f32 %v3246_v19, %v2221_v17  ;;  %v1048_v33 = vpop.f32.mrb[41].mxu0  ;;  %v1405_v30 = vpop.f32.mrb[41].mxu1  ;;  %v3250_v19 = vmax.f32 %v2727_v34, %v2729_v35 }
 0x12f   :  { %v2015_v42 = vpack.c.bf16 %v1611_v2, %v1611_v2  ;;  %v1612_v5 = vand.u32 2147483647, %v1576_v16  ;;  %v1179_v48 = vmax.f32 %v3247_v45, %v1048_v33  ;;  %v2222_v51 = vpop.f32.mrb[42].mxu0  ;;  %v2262_v8 = vpop.f32.mrb[42].mxu1  ;;  %v3251_v45 = vmax.f32 %v2733_v37, %v2735_v38 }
 0x130   :  { %1794 = vst.msk [vmem:[%s3191_s3 + $0x8] sm:$0xf] %vm1791_vm1, %v2017_v12  ;;  %v2018_v10 = vpack.c.bf16 %v1614_v15, %v1614_v15  ;;  %v1538_v11 = vmax.f32 %v1181_v20, %v2261_v27  ;;  %v1182_v23 = vmax.f32 %v3248_v22, %v2222_v51  ;;  %v1051_v24 = vpop.f32.mrb[43].mxu0  ;;  %v1408_v36 = vpop.f32.mrb[43].mxu1  ;;  %v3252_v34 = vmax.f32 %v2739_v40, %v2741_v41 }
 0x131   :  { %1792 = vst.msk [vmem:[%s3191_s3] sm:$0xf] %vm1791_vm1, %v2015_v42  ;;  %v2016_v25 = vpack.c.bf16 %v1612_v5, %v1612_v5  ;;  %v1536_v26 = vmax.f32 %v1179_v48, %v1405_v30  ;;  %v1180_v14 = vmax.f32 %v3249_v13, %v1051_v24  ;;  %v3253_v24 = vmax.f32 %v2745_v43, %v2747_v44 }
 0x132   :  { %1795 = vst.msk [vmem:[%s3191_s3 + $0xc] sm:$0xf] %vm1791_vm1, %v2018_v10  ;;  %v1581_v28 = vadd.f32 %v2901_v39, %v1538_v11  ;;  %v1539_v29 = vmax.f32 %v1182_v23, %v2262_v8 }
 0x133   :  { %1793 = vst.msk [vmem:[%s3191_s3 + $0x4] sm:$0xf] %vm1791_vm1, %v2016_v25  ;;  %v1579_v18 = vadd.f32 %v2901_v39, %v1536_v26  ;;  %v1537_v21 = vmax.f32 %v1180_v14, %v1408_v36 }
 0x134   :  { %v1617_v2 = vand.u32 2147483647, %v1581_v28  ;;  %v1582_v31 = vadd.f32 %v2901_v39, %v1539_v29 }
 0x135   :  { %v1615_v32 = vand.u32 2147483647, %v1579_v18  ;;  %v1580_v16 = vadd.f32 %v2901_v39, %v1537_v21  ;;  %v2225_v17 = vpop.f32.mrb[44].mxu0  ;;  %v2265_v27 = vpop.f32.mrb[44].mxu1 }
 0x136   :  { %v2021_v12 = vpack.c.bf16 %v1617_v2, %v1617_v2  ;;  %v1618_v15 = vand.u32 2147483647, %v1582_v31  ;;  %v1185_v20 = vmax.f32 %v3250_v19, %v2225_v17  ;;  %v1064_v33 = vpop.f32.mrb[45].mxu0  ;;  %v1421_v30 = vpop.f32.mrb[45].mxu1  ;;  %v3254_v2 = vmax.f32 %v2751_v46, %v2753_v47 }
 0x137   :  { %v2019_v42 = vpack.c.bf16 %v1615_v32, %v1615_v32  ;;  %v1616_v5 = vand.u32 2147483647, %v1580_v16  ;;  %v1183_v48 = vmax.f32 %v3251_v45, %v1064_v33  ;;  %v2226_v51 = vpop.f32.mrb[46].mxu0  ;;  %v2266_v8 = vpop.f32.mrb[46].mxu1  ;;  %v3256_v46 = vmax.f32 %v2763_v52, %v2765_v53 }
 0x138   :  { %1798 = vst.msk [vmem:[%s3191_s3 + $0x18] sm:$0xf] %vm1791_vm1, %v2021_v12  ;;  %v2022_v10 = vpack.c.bf16 %v1618_v15, %v1618_v15  ;;  %v1542_v11 = vmax.f32 %v1185_v20, %v2265_v27  ;;  %v1186_v35 = vmax.f32 %v3252_v34, %v2226_v51  ;;  %v1067_v22 = vpop.f32.mrb[47].mxu0  ;;  %v1424_v23 = vpop.f32.mrb[47].mxu1  ;;  %v3255_v12 = vmax.f32 %v2757_v49, %v2759_v50 }
 0x139   :  { %1796 = vst.msk [vmem:[%s3191_s3 + $0x10] sm:$0xf] %vm1791_vm1, %v2019_v42  ;;  %v2020_v37 = vpack.c.bf16 %v1616_v5, %v1616_v5  ;;  %v1540_v38 = vmax.f32 %v1183_v48, %v1421_v30  ;;  %v1184_v36 = vmax.f32 %v3253_v24, %v1067_v22  ;;  %v3257_v45 = vmax.f32 %v2769_v55, %v2771_v56 }
 0x13a   :  { %1799 = vst.msk [vmem:[%s3191_s3 + $0x1c] sm:$0xf] %vm1791_vm1, %v2022_v10  ;;  %v1585_v40 = vadd.f32 %v2901_v39, %v1542_v11  ;;  %v1543_v41 = vmax.f32 %v1186_v35, %v2266_v8 }
 0x13b   :  { %1797 = vst.msk [vmem:[%s3191_s3 + $0x14] sm:$0xf] %vm1791_vm1, %v2020_v37  ;;  %v1583_v25 = vadd.f32 %v2901_v39, %v1540_v38  ;;  %v1541_v26 = vmax.f32 %v1184_v36, %v1424_v23  ;;  %v3258_v37 = vmax.f32 %v2775_v58, %v2777_v59  ;;  %v3260_v58 = vmax.f32 %v2787_v0, %v2789_v1 }
 0x13c   :  { %v1621_v13 = vand.u32 2147483647, %v1585_v40  ;;  %v1586_v43 = vadd.f32 %v2901_v39, %v1543_v41 }
 0x13d   :  { %v1619_v44 = vand.u32 2147483647, %v1583_v25  ;;  %v1584_v14 = vadd.f32 %v2901_v39, %v1541_v26  ;;  %v2229_v28 = vpop.f32.mrb[48].mxu0  ;;  %v2269_v29 = vpop.f32.mrb[48].mxu1  ;;  %v3259_v25 = vmax.f32 %v2781_v61, %v2783_v62 }
 0x13e   :  { %v2025_v18 = vpack.c.bf16 %v1621_v13, %v1621_v13  ;;  %v1622_v21 = vand.u32 2147483647, %v1586_v43  ;;  %v1189_v31 = vmax.f32 %v3254_v2, %v2229_v28  ;;  %v1080_v32 = vpop.f32.mrb[49].mxu0  ;;  %v1437_v16 = vpop.f32.mrb[49].mxu1 }
 0x13f   :  { %v2023_v17 = vpack.c.bf16 %v1619_v44, %v1619_v44  ;;  %v1620_v27 = vand.u32 2147483647, %v1584_v14  ;;  %v1187_v15 = vmax.f32 %v3255_v12, %v1080_v32  ;;  %v2230_v19 = vpop.f32.mrb[50].mxu0  ;;  %v2270_v20 = vpop.f32.mrb[50].mxu1 }
 0x140   :  { %1802 = vst.msk [vmem:[%s3191_s3 + $0x28] sm:$0xf] %vm1791_vm1, %v2025_v18  ;;  %v2026_v33 = vpack.c.bf16 %v1622_v21, %v1622_v21  ;;  %v1546_v30 = vmax.f32 %v1189_v31, %v2269_v29  ;;  %v1190_v47 = vmax.f32 %v3256_v46, %v2230_v19  ;;  %v1083_v42 = vpop.f32.mrb[51].mxu0  ;;  %v1440_v5 = vpop.f32.mrb[51].mxu1  ;;  %v3261_v18 = vmax.f32 %v2793_v3, %v2795_v4 }
 0x141   :  { %1800 = vst.msk [vmem:[%s3191_s3 + $0x20] sm:$0xf] %vm1791_vm1, %v2023_v17  ;;  %v2024_v49 = vpack.c.bf16 %v1620_v27, %v1620_v27  ;;  %v1544_v50 = vmax.f32 %v1187_v15, %v1437_v16  ;;  %v1188_v48 = vmax.f32 %v3257_v45, %v1083_v42  ;;  %v3262_v19 = vmax.f32 %v2799_v6, %v2801_v7 }
 0x142   :  { %1803 = vst.msk [vmem:[%s3191_s3 + $0x2c] sm:$0xf] %vm1791_vm1, %v2026_v33  ;;  %v1589_v52 = vadd.f32 %v2901_v39, %v1546_v30  ;;  %v1547_v53 = vmax.f32 %v1190_v47, %v2270_v20  ;;  %v3263_v42 = vmax.f32 %v2805_v9, %v2807_v63  ;;  %v3264_v6 = vmax.f32 %v2811_v60, %v2813_v57 }
 0x143   :  { %1801 = vst.msk [vmem:[%s3191_s3 + $0x24] sm:$0xf] %vm1791_vm1, %v2024_v49  ;;  %v1587_v51 = vadd.f32 %v2901_v39, %v1544_v50  ;;  %v1545_v8 = vmax.f32 %v1188_v48, %v1440_v5 }
 0x144   :  { %v1625_v10 = vand.u32 2147483647, %v1589_v52  ;;  %v1590_v55 = vadd.f32 %v2901_v39, %v1547_v53 }
 0x145   :  { %v1623_v56 = vand.u32 2147483647, %v1587_v51  ;;  %v1588_v11 = vadd.f32 %v2901_v39, %v1545_v8  ;;  %v2233_v34 = vpop.f32.mrb[52].mxu0  ;;  %v2273_v35 = vpop.f32.mrb[52].mxu1  ;;  %v3265_v51 = vld [vmem:[#allocation2_spill] sm:$0xff] }
 0x146   :  { %v2029_v22 = vpack.c.bf16 %v1625_v10, %v1625_v10  ;;  %v1626_v23 = vand.u32 2147483647, %v1590_v55  ;;  %v1193_v38 = vmax.f32 %v3258_v37, %v2233_v34  ;;  %v1096_v24 = vpop.f32.mrb[53].mxu0  ;;  %v1453_v36 = vpop.f32.mrb[53].mxu1  ;;  %v3266_v8 = vmax.f32 %v2817_v54, %v3265_v51  ;;  %v3282_v51 = vld [vmem:[#allocation13_spill] sm:$0xff] }
 0x147   :  { %v2027_v40 = vpack.c.bf16 %v1623_v56, %v1623_v56  ;;  %v1624_v41 = vand.u32 2147483647, %v1588_v11  ;;  %v1191_v26 = vmax.f32 %v3259_v25, %v1096_v24  ;;  %v2234_v13 = vpop.f32.mrb[54].mxu0  ;;  %v2274_v43 = vpop.f32.mrb[54].mxu1  ;;  %v3267_v24 = vld [vmem:[#allocation3_spill] sm:$0xff] }
 0x148   :  { %1806 = vst.msk [vmem:[%s3191_s3 + $0x38] sm:$0xf] %vm1791_vm1, %v2029_v22  ;;  %v2030_v44 = vpack.c.bf16 %v1626_v23, %v1626_v23  ;;  %v1550_v14 = vmax.f32 %v1193_v38, %v2273_v35  ;;  %v1194_v59 = vmax.f32 %v3260_v58, %v2234_v13  ;;  %v1099_v28 = vpop.f32.mrb[55].mxu0  ;;  %v1456_v29 = vpop.f32.mrb[55].mxu1 }
 0x149   :  { %1804 = vst.msk [vmem:[%s3191_s3 + $0x30] sm:$0xf] %vm1791_vm1, %v2027_v40  ;;  %v2028_v61 = vpack.c.bf16 %v1624_v41, %v1624_v41  ;;  %v1548_v62 = vmax.f32 %v1191_v26, %v1453_v36  ;;  %v1192_v21 = vmax.f32 %v3261_v18, %v1099_v28  ;;  %v3268_v36 = vld [vmem:[#allocation4_spill] sm:$0xff]  ;;  %v3273_v18 = vld [vmem:[#allocation7_spill] sm:$0xff] }
 0x14a   :  { %1807 = vst.msk [vmem:[%s3191_s3 + $0x3c] sm:$0xf] %vm1791_vm1, %v2030_v44  ;;  %v1593_v0 = vadd.f32 %v2901_v39, %v1550_v14  ;;  %v1551_v1 = vmax.f32 %v1194_v59, %v2274_v43  ;;  %v3269_v40 = vmax.f32 %v3267_v24, %v3268_v36  ;;  %v3270_v44 = vld [vmem:[#allocation5_spill] sm:$0xff]  ;;  %v3271_v14 = vld [vmem:[#allocation6_spill] sm:$0xff] }
 0x14b   :  { %1805 = vst.msk [vmem:[%s3191_s3 + $0x34] sm:$0xf] %vm1791_vm1, %v2028_v61  ;;  %v1591_v2 = vadd.f32 %v2901_v39, %v1548_v62  ;;  %v1549_v31 = vmax.f32 %v1192_v21, %v1456_v29  ;;  %v3272_v58 = vmax.f32 %v3270_v44, %v3271_v14  ;;  %v3274_v21 = vld [vmem:[#allocation8_spill] sm:$0xff]  ;;  %v3288_v36 = vld [vmem:[#allocation17_spill] sm:$0xff] }
 0x14c   :  { %v1629_v32 = vand.u32 2147483647, %v1593_v0  ;;  %v1594_v3 = vadd.f32 %v2901_v39, %v1551_v1  ;;  %v3275_v0 = vmax.f32 %v3273_v18, %v3274_v21  ;;  %v3291_v21 = vld [vmem:[#allocation19_spill] sm:$0xff] }
 0x14d   :  { %v1627_v4 = vand.u32 2147483647, %v1591_v2  ;;  %v1592_v16 = vadd.f32 %v2901_v39, %v1549_v31  ;;  %v2237_v17 = vpop.f32.mrb[56].mxu0  ;;  %v2277_v27 = vpop.f32.mrb[56].mxu1 }
 0x14e   :  { %v2033_v12 = vpack.c.bf16 %v1629_v32, %v1629_v32  ;;  %v1630_v15 = vand.u32 2147483647, %v1594_v3  ;;  %v1197_v20 = vmax.f32 %v3262_v19, %v2237_v17  ;;  %v1112_v33 = vpop.f32.mrb[57].mxu0  ;;  %v1469_v30 = vpop.f32.mrb[57].mxu1 }
 0x14f   :  { %v2031_v46 = vpack.c.bf16 %v1627_v4, %v1627_v4  ;;  %v1628_v47 = vand.u32 2147483647, %v1592_v16  ;;  %v1195_v5 = vmax.f32 %v3263_v42, %v1112_v33  ;;  %v2238_v49 = vpop.f32.mrb[58].mxu0  ;;  %v2278_v50 = vpop.f32.mrb[58].mxu1  ;;  %v3276_v4 = vld [vmem:[#allocation9_spill] sm:$0xff]  ;;  %v3277_v16 = vld [vmem:[#allocation10_spill] sm:$0xff] }
 0x150   :  { %1810 = vst.msk [vmem:[%s3191_s3 + $0x48] sm:$0xf] %vm1791_vm1, %v2033_v12  ;;  %v2034_v45 = vpack.c.bf16 %v1630_v15, %v1630_v15  ;;  %v1554_v48 = vmax.f32 %v1197_v20, %v2277_v27  ;;  %v1198_v7 = vmax.f32 %v3264_v6, %v2238_v49  ;;  %v1115_v52 = vpop.f32.mrb[59].mxu0  ;;  %v1472_v53 = vpop.f32.mrb[59].mxu1  ;;  %v3278_v17 = vmax.f32 %v3276_v4, %v3277_v16  ;;  %v3294_v16 = vld [vmem:[#allocation21_spill] sm:$0xff] }
 0x151   :  { %1808 = vst.msk [vmem:[%s3191_s3 + $0x40] sm:$0xf] %vm1791_vm1, %v2031_v46  ;;  %v2032_v63 = vpack.c.bf16 %v1628_v47, %v1628_v47  ;;  %v1552_v9 = vmax.f32 %v1195_v5, %v1469_v30  ;;  %v1196_v10 = vmax.f32 %v3266_v8, %v1115_v52  ;;  %v3283_v8 = vld [vmem:[#allocation14_spill] sm:$0xff] }
 0x152   :  { %1811 = vst.msk [vmem:[%s3191_s3 + $0x4c] sm:$0xf] %vm1791_vm1, %v2034_v45  ;;  %v1597_v57 = vadd.f32 %v2901_v39, %v1554_v48  ;;  %v1555_v60 = vmax.f32 %v1198_v7, %v2278_v50  ;;  %v3279_v45 = vld [vmem:[#allocation11_spill] sm:$0xff]  ;;  %v3280_v48 = vld [vmem:[#allocation12_spill] sm:$0xff] }
 0x153   :  { %1809 = vst.msk [vmem:[%s3191_s3 + $0x44] sm:$0xf] %vm1791_vm1, %v2032_v63  ;;  %v1595_v55 = vadd.f32 %v2901_v39, %v1552_v9  ;;  %v1553_v56 = vmax.f32 %v1196_v10, %v1472_v53  ;;  %v3281_v6 = vmax.f32 %v3279_v45, %v3280_v48  ;;  %v3284_v10 = vmax.f32 %v3282_v51, %v3283_v8  ;;  %v3300_v48 = vld [vmem:[#allocation25_spill] sm:$0xff] }
 0x154   :  { %v1633_v11 = vand.u32 2147483647, %v1597_v57  ;;  %v1598_v54 = vadd.f32 %v2901_v39, %v1555_v60 }
 0x155   :  { %v1631_v34 = vand.u32 2147483647, %v1595_v55  ;;  %v1596_v35 = vadd.f32 %v2901_v39, %v1553_v56  ;;  %v2241_v22 = vpop.f32.mrb[60].mxu0  ;;  %v2281_v23 = vpop.f32.mrb[60].mxu1 }
 0x156   :  { %v2037_v37 = vpack.c.bf16 %v1633_v11, %v1633_v11  ;;  %v1634_v38 = vand.u32 2147483647, %v1598_v54  ;;  %v1201_v41 = vmax.f32 %v3269_v40, %v2241_v22  ;;  %v1128_v25 = vpop.f32.mrb[61].mxu0  ;;  %v1485_v26 = vpop.f32.mrb[61].mxu1  ;;  %v3285_v54 = vld [vmem:[#allocation15_spill] sm:$0xff]  ;;  %v3289_v40 = vld [vmem:[#allocation18_spill] sm:$0xff] }
 0x157   :  { %v2035_v13 = vpack.c.bf16 %v1631_v34, %v1631_v34  ;;  %v1632_v43 = vand.u32 2147483647, %v1596_v35  ;;  %v1199_v59 = vmax.f32 %v3272_v58, %v1128_v25  ;;  %v2242_v28 = vpop.f32.mrb[62].mxu0  ;;  %v2282_v29 = vpop.f32.mrb[62].mxu1  ;;  %v3286_v34 = vld [vmem:[#allocation16_spill] sm:$0xff] }
 0x158   :  { %1814 = vst.msk [vmem:[%s3191_s3 + $0x58] sm:$0xf] %vm1791_vm1, %v2037_v37  ;;  %v2038_v61 = vpack.c.bf16 %v1634_v38, %v1634_v38  ;;  %v1558_v62 = vmax.f32 %v1201_v41, %v2281_v23  ;;  %v1202_v1 = vmax.f32 %v3275_v0, %v2242_v28  ;;  %v1131_v2 = vpop.f32.mrb[63].mxu0  ;;  %v1488_v31 = vpop.f32.mrb[63].mxu1  ;;  %v3287_v35 = vmax.f32 %v3285_v54, %v3286_v34  ;;  %v3292_v0 = vld [vmem:[#allocation20_spill] sm:$0xff] }
 0x159   :  { %1812 = vst.msk [vmem:[%s3191_s3 + $0x50] sm:$0xf] %vm1791_vm1, %v2035_v13  ;;  %v2036_v32 = vpack.c.bf16 %v1632_v43, %v1632_v43  ;;  %v1556_v3 = vmax.f32 %v1199_v59, %v1485_v26  ;;  %v1200_v27 = vmax.f32 %v3278_v17, %v1131_v2  ;;  %v3290_v41 = vmax.f32 %v3288_v36, %v3289_v40  ;;  %v3295_v17 = vld [vmem:[#allocation22_spill] sm:$0xff] }
 0x15a   :  { %1815 = vst.msk [vmem:[%s3191_s3 + $0x5c] sm:$0xf] %vm1791_vm1, %v2038_v61  ;;  %v1601_v12 = vadd.f32 %v2901_v39, %v1558_v62  ;;  %v1559_v15 = vmax.f32 %v1202_v1, %v2282_v29  ;;  %v3293_v1 = vmax.f32 %v3291_v21, %v3292_v0 }
 0x15b   :  { %1813 = vst.msk [vmem:[%s3191_s3 + $0x54] sm:$0xf] %vm1791_vm1, %v2036_v32  ;;  %v1599_v19 = vadd.f32 %v2901_v39, %v1556_v3  ;;  %v1557_v20 = vmax.f32 %v1200_v27, %v1488_v31  ;;  %v3296_v27 = vmax.f32 %v3294_v16, %v3295_v17 }
 0x15c   :  { %v1637_v33 = vand.u32 2147483647, %v1601_v12  ;;  %v1602_v30 = vadd.f32 %v2901_v39, %v1559_v15 }
 0x15d   :  { %v1635_v46 = vand.u32 2147483647, %v1599_v19  ;;  %v1600_v47 = vadd.f32 %v2901_v39, %v1557_v20  ;;  %v2245_v42 = vpop.f32.mrb[64].mxu0  ;;  %v2285_v5 = vpop.f32.mrb[64].mxu1 }
 0x15e   :  { %v2041_v49 = vpack.c.bf16 %v1637_v33, %v1637_v33  ;;  %v1638_v50 = vand.u32 2147483647, %v1602_v30  ;;  %v1205_v7 = vmax.f32 %v3281_v6, %v2245_v42  ;;  %v1144_v52 = vpop.f32.mrb[65].mxu0  ;;  %v1501_v53 = vpop.f32.mrb[65].mxu1  ;;  %v3297_v30 = vld [vmem:[#allocation23_spill] sm:$0xff]  ;;  %v3301_v6 = vld [vmem:[#allocation26_spill] sm:$0xff] }
 0x15f   :  { %v2039_v63 = vpack.c.bf16 %v1635_v46, %v1635_v46  ;;  %v1636_v9 = vand.u32 2147483647, %v1600_v47  ;;  %v1203_v57 = vmax.f32 %v3284_v10, %v1144_v52  ;;  %v2246_v60 = vpop.f32.mrb[66].mxu0  ;;  %v2286_v55 = vpop.f32.mrb[66].mxu1  ;;  %v3298_v46 = vld [vmem:[#allocation24_spill] sm:$0xff] }
 0x160   :  { %1818 = vst.msk [vmem:[%s3191_s3 + $0x68] sm:$0xf] %vm1791_vm1, %v2041_v49  ;;  %v2042_v56 = vpack.c.bf16 %v1638_v50, %v1638_v50  ;;  %v1562_v11 = vmax.f32 %v1205_v7, %v2285_v5  ;;  %v1206_v22 = vmax.f32 %v3287_v35, %v2246_v60  ;;  %v1147_v23 = vpop.f32.mrb[67].mxu0  ;;  %v1504_v37 = vpop.f32.mrb[67].mxu1  ;;  %v3299_v47 = vmax.f32 %v3297_v30, %v3298_v46 }
 0x161   :  { %1816 = vst.msk [vmem:[%s3191_s3 + $0x60] sm:$0xf] %vm1791_vm1, %v2039_v63  ;;  %v2040_v38 = vpack.c.bf16 %v1636_v9, %v1636_v9  ;;  %v1560_v24 = vmax.f32 %v1203_v57, %v1501_v53  ;;  %v1204_v25 = vmax.f32 %v3290_v41, %v1147_v23  ;;  %v3302_v7 = vmax.f32 %v3300_v48, %v3301_v6 }
 0x162   :  { %1819 = vst.msk [vmem:[%s3191_s3 + $0x6c] sm:$0xf] %vm1791_vm1, %v2042_v56  ;;  %v1605_v26 = vadd.f32 %v2901_v39, %v1562_v11  ;;  %v1563_v13 = vmax.f32 %v1206_v22, %v2286_v55 }
 0x163   :  { %1817 = vst.msk [vmem:[%s3191_s3 + $0x64] sm:$0xf] %vm1791_vm1, %v2040_v38  ;;  %v1603_v43 = vadd.f32 %v2901_v39, %v1560_v24  ;;  %v1561_v44 = vmax.f32 %v1204_v25, %v1504_v37 }
 0x164   :  { %v1641_v14 = vand.u32 2147483647, %v1605_v26  ;;  %v1606_v58 = vadd.f32 %v2901_v39, %v1563_v13 }
 0x165   :  { %v1639_v59 = vand.u32 2147483647, %v1603_v43  ;;  %v1604_v28 = vadd.f32 %v2901_v39, %v1561_v44  ;;  %v2249_v29 = vpop.f32.mrb[68].mxu0  ;;  %v2289_v61 = vpop.f32.mrb[68].mxu1 }
 0x166   :  { %v2045_v62 = vpack.c.bf16 %v1641_v14, %v1641_v14  ;;  %v1642_v18 = vand.u32 2147483647, %v1606_v58  ;;  %v1209_v2 = vmax.f32 %v3293_v1, %v2249_v29  ;;  %v1160_v31 = vpop.f32.mrb[69].mxu0  ;;  %v1517_v32 = vpop.f32.mrb[69].mxu1 }
 0x167   :  { %v2043_v3 = vpack.c.bf16 %v1639_v59, %v1639_v59  ;;  %v1640_v4 = vand.u32 2147483647, %v1604_v28  ;;  %v1207_v12 = vmax.f32 %v3296_v27, %v1160_v31  ;;  %v2250_v15 = vpop.f32.mrb[70].mxu0  ;;  %v2290_v19 = vpop.f32.mrb[70].mxu1 }
 0x168   :  { %1822 = vst.msk [vmem:[%s3191_s3 + $0x78] sm:$0xf] %vm1791_vm1, %v2045_v62  ;;  %v2046_v20 = vpack.c.bf16 %v1642_v18, %v1642_v18  ;;  %v1566_v33 = vmax.f32 %v1209_v2, %v2289_v61  ;;  %v1210_v42 = vmax.f32 %v3299_v47, %v2250_v15  ;;  %v1163_v5 = vpop.f32.mrb[71].mxu0  ;;  %v1520_v49 = vpop.f32.mrb[71].mxu1 }
 0x169   :  { %1820 = vst.msk [vmem:[%s3191_s3 + $0x70] sm:$0xf] %vm1791_vm1, %v2043_v3  ;;  %v2044_v50 = vpack.c.bf16 %v1640_v4, %v1640_v4  ;;  %v1564_v45 = vmax.f32 %v1207_v12, %v1517_v32  ;;  %v1208_v52 = vmax.f32 %v3302_v7, %v1163_v5 }
 0x16a   :  { %1823 = vst.msk [vmem:[%s3191_s3 + $0x7c] sm:$0xf] %vm1791_vm1, %v2046_v20  ;;  %v1609_v53 = vadd.f32 %v2901_v39, %v1566_v33  ;;  %v1567_v63 = vmax.f32 %v1210_v42, %v2290_v19 }
 0x16b   :  { %1821 = vst.msk [vmem:[%s3191_s3 + $0x74] sm:$0xf] %vm1791_vm1, %v2044_v50  ;;  %v1607_v9 = vadd.f32 %v2901_v39, %v1564_v45  ;;  %v1565_v51 = vmax.f32 %v1208_v52, %v1520_v49 }
 0x16c   :  { %v1645_v8 = vand.u32 2147483647, %v1609_v53  ;;  %v1610_v10 = vadd.f32 %v2901_v39, %v1567_v63 }
 0x16d   :  { %v1643_v57 = vand.u32 2147483647, %v1607_v9  ;;  %v1608_v60 = vadd.f32 %v2901_v39, %v1565_v51 }
 0x16e   :  { %v2049_v55 = vpack.c.bf16 %v1645_v8, %v1645_v8  ;;  %v1646_v56 = vand.u32 2147483647, %v1610_v10 }
 0x16f   :  { %v2047_v11 = vpack.c.bf16 %v1643_v57, %v1643_v57  ;;  %v1644_v54 = vand.u32 2147483647, %v1608_v60 }
 0x170   :  { %1826 = vst.msk [vmem:[%s3191_s3 + $0x88] sm:$0xf] %vm1791_vm1, %v2049_v55  ;;  %v2050_v34 = vpack.c.bf16 %v1646_v56, %v1646_v56 }
 0x171   :  { %1824 = vst.msk [vmem:[%s3191_s3 + $0x80] sm:$0xf] %vm1791_vm1, %v2047_v11  ;;  %v2048_v35 = vpack.c.bf16 %v1644_v54, %v1644_v54 }
 0x172   :  { %1827 = vst.msk [vmem:[%s3191_s3 + $0x8c] sm:$0xf] %vm1791_vm1, %v2050_v34 }
 0x173   :  { %1825 = vst.msk [vmem:[%s3191_s3 + $0x84] sm:$0xf] %vm1791_vm1, %v2048_v35 }

// kernel: net1_forward.4
= control target key start
LH: loop header
LB: loop body
LE: loop exit
PB: predicated region body
PF: predicated region fallthrough
CT: control target
= control target key end

     0   :  { %vm490_vm0 = vcmask 261120   ;;  %s861_s1 = inlined_call_operand.vmem [shape: bf16[256,32], index: 1, kind: input, shape index: {}]   ;;  %s862_s0 = inlined_call_operand.vmem [shape: bf16[2,64,256], index: 0, kind: input, shape index: {}]   ;;  %s863_s2 = inlined_call_operand.vmem [shape: f32[1,32], index: 2, kind: input, shape index: {}]   ;;  %s864_s3 = inlined_call_operand.vmem [shape: f32[1,32], index: 3, kind: input, shape index: {}]   ;;  %s865_s4 = inlined_call_operand.vmem [shape: f32[1,32], index: 4, kind: input, shape index: {}]   ;;  %s866_s5 = inlined_call_operand.vmem [shape: f32[2,16,32], index: 5, kind: output, shape index: {}]  }
   0x1   :  { %v646_v0 = vld [vmem:[%s861_s1 + $0x40] sm:$0xff]   ;;  %v648_v2 = vld [vmem:[%s861_s1 + $0x48] sm:$0xff]   ;;  %v650_v4 = vld [vmem:[%s861_s1 + $0x50] sm:$0xff]  }
   0x2   :  { %v647_v1 = vld [vmem:[%s861_s1] sm:$0xff]   ;;  %534 = vmatprep.subr.bf16.mxu0 %v646_v0  ;;  %562 = vmatprep.subr.bf16.mxu1 %v646_v0  ;;  %v649_v3 = vld [vmem:[%s861_s1 + $0x8] sm:$0xff]   ;;  %v734_v5 = vld [vmem:[%s861_s1 + $0x10] sm:$0xff]  }
   0x3   :  { %535 = vmatpush3.bf16.msra.mxu0 %v647_v1  ;;  %563 = vmatpush3.bf16.msra.mxu1 %v647_v1  ;;  %v739_v6 = vld [vmem:[%s861_s1 + $0x58] sm:$0xff]   ;;  %v753_v8 = vld [vmem:[%s861_s1 + $0x60] sm:$0xff]   ;;  %v656_v10 = vld [vmem:[%s861_s1 + $0x68] sm:$0xff]  }
   0x4   :  { %536 = vmatprep.subr.bf16.mxu0 %v648_v2  ;;  %564 = vmatprep.subr.bf16.mxu1 %v648_v2  ;;  %v746_v7 = vld [vmem:[%s861_s1 + $0x18] sm:$0xff]   ;;  %v655_v9 = vld [vmem:[%s861_s1 + $0x20] sm:$0xff]   ;;  %v657_v13 = vld [vmem:[%s861_s1 + $0x28] sm:$0xff]  }
   0x5   :  { %v664_v11 = vld [vmem:[%s862_s0 + $0x4] ss:$8 sps:$4 sm:$0xff]   ;;  %v667_v12 = vld [vmem:[%s862_s0 + $0x14] ss:$8 sps:$4 sm:$0xff]   ;;  %v662_v18 = vld [vmem:[%s862_s0] ss:$8 sps:$4 sm:$0xff]  }
   0x6   :  { %v658_v14 = vld [vmem:[%s861_s1 + $0x70] sm:$0xff]   ;;  %217 = vmatprep.mubr.bf16.mxu0 %v664_v11  ;;  %286 = vmatprep.mubr.bf16.mxu1 %v667_v12  ;;  %v660_v16 = vld [vmem:[%s861_s1 + $0x78] sm:$0xff]   ;;  %v668_v20 = vld [vmem:[%s862_s0 + $0x44] ss:$8 sps:$4 sm:$0xff]  }
   0x7   :  { %537 = vmatpush3.bf16.msra.mxu0 %v649_v3  ;;  %565 = vmatpush3.bf16.msra.mxu1 %v649_v3  ;;  %v659_v15 = vld [vmem:[%s861_s1 + $0x30] sm:$0xff]   ;;  %v661_v17 = vld [vmem:[%s861_s1 + $0x38] sm:$0xff]   ;;  %v672_v22 = vld [vmem:[%s862_s0 + $0x40] ss:$8 sps:$4 sm:$0xff]  }
   0x8   :  { %538 = vmatprep.subr.bf16.mxu0 %v650_v4  ;;  %566 = vmatprep.subr.bf16.mxu1 %v650_v4  ;;  %v665_v19 = vld [vmem:[%s862_s0 + $0x10] ss:$8 sps:$4 sm:$0xff]   ;;  %v670_v21 = vld [vmem:[%s862_s0 + $0x54] ss:$8 sps:$4 sm:$0xff]   ;;  %v676_v24 = vld [vmem:[%s862_s0 + $0x24] ss:$8 sps:$4 sm:$0xff]  }
   0x9   :  { %v673_v23 = vld [vmem:[%s862_s0 + $0x50] ss:$8 sps:$4 sm:$0xff]   ;;  %v679_v25 = vld [vmem:[%s862_s0 + $0x34] ss:$8 sps:$4 sm:$0xff]   ;;  %v674_v26 = vld [vmem:[%s862_s0 + $0x20] ss:$8 sps:$4 sm:$0xff]  }
   0xa   :  { %v677_v27 = vld [vmem:[%s862_s0 + $0x30] ss:$8 sps:$4 sm:$0xff]   ;;  %v680_v28 = vld [vmem:[%s862_s0 + $0x64] ss:$8 sps:$4 sm:$0xff]   ;;  %v682_v29 = vld [vmem:[%s862_s0 + $0x74] ss:$8 sps:$4 sm:$0xff]  }
   0xb   :  { %539 = vmatpush3.bf16.msra.mxu0 %v734_v5  ;;  %567 = vmatpush3.bf16.msra.mxu1 %v734_v5  ;;  %v684_v30 = vld [vmem:[%s862_s0 + $0x60] ss:$8 sps:$4 sm:$0xff]   ;;  %v685_v31 = vld [vmem:[%s862_s0 + $0x70] ss:$8 sps:$4 sm:$0xff]  }
   0xc   :  { %540 = vmatprep.subr.bf16.mxu0 %v739_v6  ;;  %568 = vmatprep.subr.bf16.mxu1 %v739_v6 }
   0xf   :  { %541 = vmatpush3.bf16.msra.mxu0 %v746_v7  ;;  %569 = vmatpush3.bf16.msra.mxu1 %v746_v7 }
  0x10   :  { %542 = vmatprep.subr.bf16.mxu0 %v753_v8  ;;  %570 = vmatprep.subr.bf16.mxu1 %v753_v8 }
  0x13   :  { %543 = vmatpush3.bf16.msra.mxu0 %v655_v9  ;;  %571 = vmatpush3.bf16.msra.mxu1 %v655_v9 }
  0x14   :  { %544 = vmatprep.subr.bf16.mxu0 %v656_v10  ;;  %572 = vmatprep.subr.bf16.mxu1 %v656_v10 }
  0x17   :  { %545 = vmatpush3.bf16.msra.mxu0 %v657_v13  ;;  %573 = vmatpush3.bf16.msra.mxu1 %v657_v13 }
  0x18   :  { %546 = vmatprep.subr.bf16.mxu0 %v658_v14  ;;  %574 = vmatprep.subr.bf16.mxu1 %v658_v14 }
  0x1b   :  { %547 = vmatpush3.bf16.msra.mxu0 %v659_v15  ;;  %575 = vmatpush3.bf16.msra.mxu1 %v659_v15 }
  0x1c   :  { %548 = vmatprep.subr.bf16.mxu0 %v660_v16  ;;  %576 = vmatprep.subr.bf16.mxu1 %v660_v16 }
  0x1f   :  { %549 = vmatpush3.bf16.msra.mxu0 %v661_v17  ;;  %577 = vmatpush3.bf16.msra.mxu1 %v661_v17 }
  0x20   :  { %590 = vmatprep.subr.bf16.mxu0 %v646_v0  ;;  %618 = vmatprep.subr.bf16.mxu1 %v646_v0 }
  0x22   :  { %218 = vmatmul.mubr.bf16.vlgmr.msra.gmra.mrb[0].mxu0 %v662_v18  ;;  %287 = vmatmul.mubr.bf16.vlgmr.msra.gmra.mrb[0].mxu1 %v665_v19 }
  0x23   :  { %591 = vmatpush3.bf16.msra.mxu0 %v647_v1  ;;  %619 = vmatpush3.bf16.msra.mxu1 %v647_v1 }
  0x24   :  { %592 = vmatprep.subr.bf16.mxu0 %v648_v2  ;;  %620 = vmatprep.subr.bf16.mxu1 %v648_v2 }
  0x25   :  { %225 = vmatprep.mubr.bf16.mxu0 %v668_v20  ;;  %294 = vmatprep.mubr.bf16.mxu1 %v670_v21 }
  0x27   :  { %593 = vmatpush3.bf16.msra.mxu0 %v649_v3  ;;  %621 = vmatpush3.bf16.msra.mxu1 %v649_v3 }
  0x28   :  { %594 = vmatprep.subr.bf16.mxu0 %v650_v4  ;;  %622 = vmatprep.subr.bf16.mxu1 %v650_v4 }
  0x2a   :  { %226 = vmatmul.mubr.bf16.gmra.mrb[4].mxu0 %v672_v22  ;;  %295 = vmatmul.mubr.bf16.gmra.mrb[4].mxu1 %v673_v23 }
  0x2b   :  { %595 = vmatpush3.bf16.msra.mxu0 %v734_v5  ;;  %623 = vmatpush3.bf16.msra.mxu1 %v734_v5 }
  0x2c   :  { %596 = vmatprep.subr.bf16.mxu0 %v739_v6  ;;  %624 = vmatprep.subr.bf16.mxu1 %v739_v6 }
  0x2d   :  { %359 = vmatprep.mubr.bf16.mxu0 %v676_v24  ;;  %432 = vmatprep.mubr.bf16.mxu1 %v679_v25  ;;  %v533_v25 = vld [vmem:[%s865_s4] ss:$0 sm:$0xff] }
  0x2f   :  { %597 = vmatpush3.bf16.msra.mxu0 %v746_v7  ;;  %625 = vmatpush3.bf16.msra.mxu1 %v746_v7 }
  0x30   :  { %598 = vmatprep.subr.bf16.mxu0 %v753_v8  ;;  %626 = vmatprep.subr.bf16.mxu1 %v753_v8 }
  0x33   :  { %599 = vmatpush3.bf16.msra.mxu0 %v655_v9  ;;  %627 = vmatpush3.bf16.msra.mxu1 %v655_v9  ;;  %v531_v9 = vld [vmem:[%s863_s2] ss:$0 sm:$0xff] }
  0x34   :  { %600 = vmatprep.subr.bf16.mxu0 %v656_v10  ;;  %628 = vmatprep.subr.bf16.mxu1 %v656_v10 }
  0x37   :  { %601 = vmatpush3.bf16.msra.mxu0 %v657_v13  ;;  %629 = vmatpush3.bf16.msra.mxu1 %v657_v13 }
  0x38   :  { %602 = vmatprep.subr.bf16.mxu0 %v658_v14  ;;  %630 = vmatprep.subr.bf16.mxu1 %v658_v14 }
  0x3b   :  { %603 = vmatpush3.bf16.msra.mxu0 %v659_v15  ;;  %631 = vmatpush3.bf16.msra.mxu1 %v659_v15 }
  0x3c   :  { %604 = vmatprep.subr.bf16.mxu0 %v660_v16  ;;  %632 = vmatprep.subr.bf16.mxu1 %v660_v16  ;;  %v532_v16 = vld [vmem:[%s864_s3] ss:$0 sm:$0xff] }
  0x3f   :  { %605 = vmatpush3.bf16.msra.mxu0 %v661_v17  ;;  %633 = vmatpush3.bf16.msra.mxu1 %v661_v17 }
  0x42   :  { %360 = vmatmul.mubr.bf16.vlgmr.msra.gmra.mrb[8].mxu0 %v674_v26  ;;  %433 = vmatmul.mubr.bf16.vlgmr.msra.gmra.mrb[8].mxu1 %v677_v27 }
  0x43   :  { %367 = vmatprep.mubr.bf16.mxu0 %v680_v28  ;;  %440 = vmatprep.mubr.bf16.mxu1 %v682_v29 }
  0x4a   :  { %368 = vmatmul.mubr.bf16.gmra.mrb[12].mxu0 %v684_v30  ;;  %441 = vmatmul.mubr.bf16.gmra.mrb[12].mxu1 %v685_v31 }
  0xf5   :  { %v550_v32 = vpop.f32.mrb[0].mxu0  ;;  %v578_v33 = vpop.f32.mrb[0].mxu1 }
  0xf6   :  { %v551_v34 = vpop.f32.mrb[1].mxu0  ;;  %v579_v35 = vpop.f32.mrb[1].mxu1 }
  0xf7   :  { %v552_v36 = vadd.f32 %v551_v34, %v550_v32  ;;  %v580_v37 = vadd.f32 %v579_v35, %v578_v33  ;;  %v553_v38 = vpop.f32.mrb[2].mxu0  ;;  %v581_v39 = vpop.f32.mrb[2].mxu1 }
  0xf8   :  { %v554_v40 = vpop.f32.mrb[3].mxu0  ;;  %v582_v41 = vpop.f32.mrb[3].mxu1 }
  0xf9   :  { %v303_v42 = vmax.f32 %v552_v36, %v580_v37  ;;  %v555_v43 = vadd.f32 %v554_v40, %v553_v38  ;;  %v583_v44 = vadd.f32 %v582_v41, %v581_v39 }
  0xfb   :  { %v304_v45 = vmax.f32 %v555_v43, %v583_v44 }
  0xfd   :  { %v556_v46 = vpop.f32.mrb[4].mxu0  ;;  %v584_v47 = vpop.f32.mrb[4].mxu1 }
  0xfe   :  { %v557_v48 = vpop.f32.mrb[5].mxu0  ;;  %v585_v49 = vpop.f32.mrb[5].mxu1 }
  0xff   :  { %v558_v50 = vadd.f32 %v557_v48, %v556_v46  ;;  %v586_v51 = vadd.f32 %v585_v49, %v584_v47  ;;  %v559_v52 = vpop.f32.mrb[6].mxu0  ;;  %v587_v53 = vpop.f32.mrb[6].mxu1 }
 0x100   :  { %v560_v54 = vpop.f32.mrb[7].mxu0  ;;  %v588_v55 = vpop.f32.mrb[7].mxu1 }
 0x101   :  { %v305_v56 = vmax.f32 %v558_v50, %v586_v51  ;;  %v561_v57 = vadd.f32 %v560_v54, %v559_v52  ;;  %v589_v58 = vadd.f32 %v588_v55, %v587_v53 }
 0x103   :  { %v306_v59 = vmax.f32 %v561_v57, %v589_v58 }
 0x115   :  { %v606_v60 = vpop.f32.mrb[8].mxu0  ;;  %v634_v61 = vpop.f32.mrb[8].mxu1 }
 0x116   :  { %v607_v62 = vpop.f32.mrb[9].mxu0  ;;  %v635_v63 = vpop.f32.mrb[9].mxu1 }
 0x117   :  { %v608_v0 = vadd.f32 %v607_v62, %v606_v60  ;;  %v636_v1 = vadd.f32 %v635_v63, %v634_v61  ;;  %v609_v2 = vpop.f32.mrb[10].mxu0  ;;  %v637_v3 = vpop.f32.mrb[10].mxu1 }
 0x118   :  { %v610_v4 = vpop.f32.mrb[11].mxu0  ;;  %v638_v5 = vpop.f32.mrb[11].mxu1 }
 0x119   :  { %v376_v6 = vmax.f32 %v303_v42, %v608_v0  ;;  %v611_v7 = vadd.f32 %v610_v4, %v609_v2  ;;  %v639_v8 = vadd.f32 %v638_v5, %v637_v3 }
 0x11b   :  { %v449_v10 = vmax.f32 %v376_v6, %v636_v1  ;;  %v377_v11 = vmax.f32 %v304_v45, %v611_v7 }
 0x11d   :  { %v460_v12 = vadd.f32 %v531_v9, %v449_v10  ;;  %v450_v13 = vmax.f32 %v377_v11, %v639_v8  ;;  %v612_v14 = vpop.f32.mrb[12].mxu0  ;;  %v640_v15 = vpop.f32.mrb[12].mxu1 }
 0x11e   :  { %v613_v17 = vpop.f32.mrb[13].mxu0  ;;  %v641_v18 = vpop.f32.mrb[13].mxu1 }
 0x11f   :  { %v464_v19 = vmax.f32 %v460_v12, 0.0  ;;  %v461_v20 = vadd.f32 %v531_v9, %v450_v13  ;;  %v614_v21 = vadd.f32 %v613_v17, %v612_v14  ;;  %v642_v22 = vadd.f32 %v641_v18, %v640_v15  ;;  %v615_v23 = vpop.f32.mrb[14].mxu0  ;;  %v643_v24 = vpop.f32.mrb[14].mxu1 }
 0x120   :  { %v616_v26 = vpop.f32.mrb[15].mxu0  ;;  %v644_v27 = vpop.f32.mrb[15].mxu1 }
 0x121   :  { %v475_v28 = vmul.f32 %v532_v16, %v464_v19  ;;  %v465_v29 = vmax.f32 %v461_v20, 0.0  ;;  %v378_v30 = vmax.f32 %v305_v56, %v614_v21  ;;  %v617_v31 = vadd.f32 %v616_v26, %v615_v23 }
 0x122   :  { %v645_v32 = vadd.f32 %v644_v27, %v643_v24 }
 0x123   :  { %v486_v33 = vadd.f32 %v533_v25, %v475_v28  ;;  %v476_v34 = vmul.f32 %v532_v16, %v465_v29  ;;  %v451_v35 = vmax.f32 %v378_v30, %v642_v22  ;;  %v379_v36 = vmax.f32 %v306_v59, %v617_v31 }
 0x125   :  { %491 = vst.msk [vmem:[%s866_s5] sm:$0xff] %vm490_vm0, %v486_v33  ;;  %v487_v37 = vadd.f32 %v533_v25, %v476_v34  ;;  %v462_v38 = vadd.f32 %v531_v9, %v451_v35  ;;  %v452_v39 = vmax.f32 %v379_v36, %v645_v32 }
 0x127   :  { %492 = vst.msk [vmem:[%s866_s5 + $0x8] sm:$0xff] %vm490_vm0, %v487_v37  ;;  %v466_v40 = vmax.f32 %v462_v38, 0.0  ;;  %v463_v41 = vadd.f32 %v531_v9, %v452_v39 }
 0x129   :  { %v477_v42 = vmul.f32 %v532_v16, %v466_v40  ;;  %v467_v43 = vmax.f32 %v463_v41, 0.0 }
 0x12b   :  { %v488_v44 = vadd.f32 %v533_v25, %v477_v42  ;;  %v478_v45 = vmul.f32 %v532_v16, %v467_v43 }
 0x12d   :  { %493 = vst.msk [vmem:[%s866_s5 + $0x10] sm:$0xff] %vm490_vm0, %v488_v44  ;;  %v489_v46 = vadd.f32 %v533_v25, %v478_v45 }
 0x12f   :  { %494 = vst.msk [vmem:[%s866_s5 + $0x18] sm:$0xff] %vm490_vm0, %v489_v46 }

// kernel: net1_forward.5
= control target key start
LH: loop header
LB: loop body
LE: loop exit
PB: predicated region body
PF: predicated region fallthrough
CT: control target
= control target key end

     0   :  { %v680_v39 = vmov 0.0   ;;  %vm681_vm0 = vmmov 0   ;;  %v493_v62 = vlaneseq  ;;  %s847_s1 = inlined_call_operand.vmem [shape: bf16[512,128], index: 1, kind: input, shape index: {}]   ;;  %s848_s0 = inlined_call_operand.vmem [shape: bf16[8,512], index: 0, kind: input, shape index: {}]   ;;  %s849_s3 = inlined_call_operand.vmem [shape: bf16[128,128], index: 3, kind: input, shape index: {}]   ;;  %s850_s2 = inlined_call_operand.vmem [shape: f32[1,128], index: 2, kind: input, shape index: {}]   ;;  %s851_s4 = inlined_call_operand.vmem [shape: f32[1,128], index: 4, kind: input, shape index: {}]   ;;  %s852_s5 = inlined_call_operand.vmem [shape: f32[8,128], index: 5, kind: output, shape index: {}]  }
   0x1   :  { %v632_v0 = vld [vmem:[%s847_s1 + $0x40] sm:$0xff]   ;;  %v636_v4 = vld [vmem:[%s847_s1 + $0x48] sm:$0xff]   ;;  %v640_v8 = vld [vmem:[%s847_s1 + $0x50] sm:$0xff]  }
   0x2   :  { %v633_v1 = vld [vmem:[%s847_s1 + $0xc0] sm:$0xff]   ;;  %557 = vmatprep.subr.bf16.mxu0 %v632_v0  ;;  %v637_v5 = vld [vmem:[%s847_s1 + $0xc8] sm:$0xff]   ;;  %v641_v9 = vld [vmem:[%s847_s1 + $0xd0] sm:$0xff]   ;;  %v494_v63 = vand.u32 127, %v493_v62 }
   0x3   :  { %v634_v2 = vld [vmem:[%s847_s1] sm:$0xff]   ;;  %579 = vmatprep.subr.bf16.mxu1 %v633_v1  ;;  %v638_v6 = vld [vmem:[%s847_s1 + $0x8] sm:$0xff]   ;;  %v642_v10 = vld [vmem:[%s847_s1 + $0x10] sm:$0xff]  }
   0x4   :  { %v635_v3 = vld [vmem:[%s847_s1 + $0x80] sm:$0xff]   ;;  %558 = vmatpush3.bf16.msra.mxu0 %v634_v2  ;;  %v639_v7 = vld [vmem:[%s847_s1 + $0x88] sm:$0xff]   ;;  %v643_v11 = vld [vmem:[%s847_s1 + $0x90] sm:$0xff]   ;;  %vm495_vm1 = vcmp.lt.s32.totalorder %v494_v63, 10 }
   0x5   :  { %580 = vmatpush3.bf16.msra.mxu1 %v635_v3  ;;  %559 = vmatprep.subr.bf16.mxu0 %v636_v4  ;;  %v644_v12 = vld [vmem:[%s847_s1 + $0x58] sm:$0xff]   ;;  %v648_v16 = vld [vmem:[%s847_s1 + $0x60] sm:$0xff]   ;;  %v652_v20 = vld [vmem:[%s847_s1 + $0x68] sm:$0xff]  }
   0x6   :  { %581 = vmatprep.subr.bf16.mxu1 %v637_v5  ;;  %v645_v13 = vld [vmem:[%s847_s1 + $0xd8] sm:$0xff]   ;;  %v649_v17 = vld [vmem:[%s847_s1 + $0xe0] sm:$0xff]   ;;  %v653_v21 = vld [vmem:[%s847_s1 + $0xe8] sm:$0xff]  }
   0x7   :  { %v646_v14 = vld [vmem:[%s847_s1 + $0x18] sm:$0xff]   ;;  %v650_v18 = vld [vmem:[%s847_s1 + $0x20] sm:$0xff]   ;;  %v654_v22 = vld [vmem:[%s847_s1 + $0x28] sm:$0xff]  }
   0x8   :  { %560 = vmatpush3.bf16.msra.mxu0 %v638_v6  ;;  %v647_v15 = vld [vmem:[%s847_s1 + $0x98] sm:$0xff]   ;;  %v651_v19 = vld [vmem:[%s847_s1 + $0xa0] sm:$0xff]   ;;  %v655_v23 = vld [vmem:[%s847_s1 + $0xa8] sm:$0xff]  }
   0x9   :  { %582 = vmatpush3.bf16.msra.mxu1 %v639_v7  ;;  %561 = vmatprep.subr.bf16.mxu0 %v640_v8  ;;  %v656_v24 = vld [vmem:[%s847_s1 + $0x70] sm:$0xff]   ;;  %v660_v28 = vld [vmem:[%s847_s1 + $0x78] sm:$0xff]   ;;  %v21_v32 = vld [vmem:[%s848_s0] sm:$0xff] }
   0xa   :  { %583 = vmatprep.subr.bf16.mxu1 %v641_v9  ;;  %v657_v25 = vld [vmem:[%s847_s1 + $0xf0] sm:$0xff]   ;;  %v661_v29 = vld [vmem:[%s847_s1 + $0xf8] sm:$0xff]   ;;  %v22_v33 = vld [vmem:[%s848_s0 + $0x8] sm:$0xff]  ;;  %v512_v34 = vcombine.low %v21_v32, %v21_v32  ;;  %v513_v35 = vcombine.high %v21_v32, %v21_v32 }
   0xb   :  { %v658_v26 = vld [vmem:[%s847_s1 + $0x30] sm:$0xff]   ;;  %v662_v30 = vld [vmem:[%s847_s1 + $0x38] sm:$0xff]   ;;  %v514_v36 = vcombine.low %v22_v33, %v22_v33  ;;  %v515_v37 = vcombine.high %v22_v33, %v22_v33  ;;  %v668_v38 = vld [vmem:[%s849_s3] sm:$0xff]  }
   0xc   :  { %562 = vmatpush3.bf16.msra.mxu0 %v642_v10  ;;  %v659_v27 = vld [vmem:[%s847_s1 + $0xb0] sm:$0xff]   ;;  %v663_v31 = vld [vmem:[%s847_s1 + $0xb8] sm:$0xff]   ;;  %332 = vmatprep.mubr.bf16.mxu0 %v513_v35  ;;  %v669_v40 = vld [vmem:[%s849_s3 + $0x8] sm:$0xff]  }
   0xd   :  { %584 = vmatpush3.bf16.msra.mxu1 %v643_v11  ;;  %563 = vmatprep.subr.bf16.mxu0 %v644_v12  ;;  %v670_v41 = vld [vmem:[%s849_s3 + $0x10] sm:$0xff]   ;;  %v671_v42 = vld [vmem:[%s849_s3 + $0x18] sm:$0xff]   ;;  %v672_v43 = vld [vmem:[%s849_s3 + $0x20] sm:$0xff]  }
   0xe   :  { %585 = vmatprep.subr.bf16.mxu1 %v645_v13  ;;  %372 = vmatprep.mubr.bf16.mxu1 %v515_v37  ;;  %v673_v44 = vld [vmem:[%s849_s3 + $0x28] sm:$0xff]   ;;  %v674_v45 = vld [vmem:[%s849_s3 + $0x30] sm:$0xff]   ;;  %v675_v46 = vld [vmem:[%s849_s3 + $0x38] sm:$0xff]  }
   0xf   :  { %v511_v49 = vld [vmem:[%s850_s2] ss:$0 sm:$0xff] }
  0x10   :  { %564 = vmatpush3.bf16.msra.mxu0 %v646_v14  ;;  %v548_v0 = vld [vmem:[%s851_s4] ss:$0 sm:$0xff] }
  0x11   :  { %586 = vmatpush3.bf16.msra.mxu1 %v647_v15  ;;  %565 = vmatprep.subr.bf16.mxu0 %v648_v16 }
  0x12   :  { %587 = vmatprep.subr.bf16.mxu1 %v649_v17 }
  0x14   :  { %566 = vmatpush3.bf16.msra.mxu0 %v650_v18 }
  0x15   :  { %588 = vmatpush3.bf16.msra.mxu1 %v651_v19  ;;  %567 = vmatprep.subr.bf16.mxu0 %v652_v20 }
  0x16   :  { %589 = vmatprep.subr.bf16.mxu1 %v653_v21 }
  0x18   :  { %568 = vmatpush3.bf16.msra.mxu0 %v654_v22 }
  0x19   :  { %590 = vmatpush3.bf16.msra.mxu1 %v655_v23  ;;  %569 = vmatprep.subr.bf16.mxu0 %v656_v24 }
  0x1a   :  { %591 = vmatprep.subr.bf16.mxu1 %v657_v25 }
  0x1c   :  { %570 = vmatpush3.bf16.msra.mxu0 %v658_v26 }
  0x1d   :  { %592 = vmatpush3.bf16.msra.mxu1 %v659_v27  ;;  %571 = vmatprep.subr.bf16.mxu0 %v660_v28 }
  0x1e   :  { %593 = vmatprep.subr.bf16.mxu1 %v661_v29 }
  0x20   :  { %572 = vmatpush3.bf16.msra.mxu0 %v662_v30 }
  0x21   :  { %594 = vmatpush3.bf16.msra.mxu1 %v663_v31  ;;  %610 = vmatprep.subr.bf16.mxu0 %v680_v39 }
  0x23   :  { %333 = vmatmul.mubr.bf16.vlgmr.msra.gmra.mrb[0].mxu0 %v512_v34 }
  0x24   :  { %373 = vmatmul.mubr.bf16.vlgmr.msra.gmra.mrb[0].mxu1 %v514_v36  ;;  %611 = vmatpush3.bf16.msra.mxu0 %v668_v38 }
  0x25   :  { %612 = vmatprep.subr.bf16.mxu0 %v680_v39  ;;  %626 = vmatprep.mubr.msk.bf16.mxu0 %vm681_vm0, %v680_v39 }
  0x28   :  { %613 = vmatpush3.bf16.msra.mxu0 %v669_v40 }
  0x29   :  { %614 = vmatprep.subr.bf16.mxu0 %v680_v39 }
  0x2c   :  { %615 = vmatpush3.bf16.msra.mxu0 %v670_v41 }
  0x2d   :  { %616 = vmatprep.subr.bf16.mxu0 %v680_v39 }
  0x30   :  { %617 = vmatpush3.bf16.msra.mxu0 %v671_v42 }
  0x31   :  { %618 = vmatprep.subr.bf16.mxu0 %v680_v39 }
  0x34   :  { %619 = vmatpush3.bf16.msra.mxu0 %v672_v43 }
  0x35   :  { %620 = vmatprep.subr.bf16.mxu0 %v680_v39 }
  0x38   :  { %621 = vmatpush3.bf16.msra.mxu0 %v673_v44 }
  0x39   :  { %622 = vmatprep.subr.bf16.mxu0 %v680_v39 }
  0x3c   :  { %623 = vmatpush3.bf16.msra.mxu0 %v674_v45 }
  0x3d   :  { %624 = vmatprep.subr.bf16.mxu0 %v680_v39 }
  0x40   :  { %625 = vmatpush3.bf16.msra.mxu0 %v675_v46 }
  0xf6   :  { %v573_v47 = vpop.f32.mrb[0].mxu0 }
  0xf7   :  { %v595_v48 = vpop.f32.mrb[0].mxu1  ;;  %v574_v50 = vpop.f32.mrb[1].mxu0 }
  0xf8   :  { %v596_v51 = vpop.f32.mrb[1].mxu1  ;;  %v575_v52 = vadd.f32 %v574_v50, %v573_v47  ;;  %v576_v54 = vpop.f32.mrb[2].mxu0 }
  0xf9   :  { %v597_v53 = vadd.f32 %v596_v51, %v595_v48  ;;  %v598_v55 = vpop.f32.mrb[2].mxu1  ;;  %v577_v56 = vpop.f32.mrb[3].mxu0 }
  0xfa   :  { %v599_v57 = vpop.f32.mrb[3].mxu1  ;;  %v335_v58 = vadd.f32 %v575_v52, %v511_v49 }
  0xfc   :  { %v375_v59 = vadd.f32 %v597_v53, %v335_v58 }
  0xfe   :  { %v380_v60 = vmax.f32 %v375_v59, 0.0 }
 0x100   :  { %v381_v61 = vpack.c.bf16 %v380_v60, %v380_v60 }
 0x102   :  { %627 = vmatmul.mubr.bf16.vlgmr.msra.gmra.mrb[4].mxu0 %v381_v61 }
 0x1d5   :  { %v487_v1 = vpop.f32.mrb[4].mxu0 }
 0x1d6   :  { %v488_v2 = vadd.f32 %v548_v0, %v487_v1  ;;  %v628_v3 = vpop.f32.mrb[5].mxu0 }
 0x1d7   :  { %v490_v4 = vpop.f32.mrb[6].mxu0 }
 0x1d8   :  { %v629_v5 = vpop.f32.mrb[7].mxu0  ;;  %v496_v6 = vsel %vm495_vm1, %v488_v2, -1e+30 }
 0x1d9   :  { %497 = vmax.xlane.f32.xlu0 %v496_v6 }
 0x266   :  { %v498_v7 = vpop.xlane.xlu0 %497 }
 0x267   :  { %v499_v8 = vsub.f32 %v496_v6, %v498_v7 }
 0x269   :  { %v500_v9 = vmul.f32 1.442695, %v499_v8 }
 0x26b   :  { %676 = vpow2.f32 %v500_v9 }
 0x275   :  { %v677_v10 = vpop.eup %676 }
 0x276   :  { %502 = vadd.xlane.f32.xlu0 %v677_v10 }
 0x303   :  { %v503_v11 = vpop.xlane.xlu0 %502 }
 0x304   :  { %678 = vrcp.f32 %v503_v11 }
 0x30e   :  { %v679_v12 = vpop.eup %678 }
 0x30f   :  { %v505_v13 = vmul.f32 %v679_v12, %v677_v10 }
 0x311   :  { %506 = vst [vmem:[%s852_s5] sm:$0xff] %v505_v13 }

</bundles_post_ra>
